<compile_context>
chip_gen: v7x
topology: tpu7x:2x2x1
jax: 0.10.0
libtpu: 0.0.40
codegen_flags: <defaults>
</compile_context>

<pallas_src>
import functools

import numpy as np

import jax
import jax.numpy as jnp
from jax.experimental import pallas as pl
from jax.experimental.pallas import tpu as pltpu


_WEIGHT_ORDER = ("band1", "b1row", "band2", "b2row",
                 "g1", "fc1b", "fc2w", "fc2b", "fc3w", "fc3b")


# ---------------------------------------------------------------------------
# Parameters (PyTorch layout) and packing into kernel-ready matrices
# ---------------------------------------------------------------------------
def init_params(key):
    ks = jax.random.split(key, 10)

    def u(k, shape, fan_in):
        bound = 1.0 / np.sqrt(np.float32(fan_in))
        return jax.random.uniform(k, shape, jnp.float32, -bound, bound)

    return {
        "conv1_w": u(ks[0], (6, 1, 5, 5), 25),   "conv1_b": u(ks[1], (6,), 25),
        "conv2_w": u(ks[2], (16, 6, 5, 5), 150), "conv2_b": u(ks[3], (16,), 150),
        "fc1_w": u(ks[4], (120, 256), 256),      "fc1_b": u(ks[5], (120,), 256),
        "fc2_w": u(ks[6], (84, 120), 120),       "fc2_b": u(ks[7], (84,), 120),
        "fc3_w": u(ks[8], (10, 84), 84),         "fc3_b": u(ks[9], (10,), 84),
    }


def pack_params(params):
    """One-time rewrite of PyTorch-layout weights into the kernel's matrices.

    * conv weights become "banded" matrices (one per kernel row kh) whose two
      W-pool phases are concatenated along N, each phase padded to a 128-lane
      boundary so the pool halves are tile-aligned slices.
    * the PyTorch (C, H, W) flatten order before fc1 is folded into g1.
    * all matmul operands are stored in bf16; biases stay f32.
    """
    w1 = np.asarray(params["conv1_w"], np.float32)     # (6, 1, 5, 5)
    b1 = np.asarray(params["conv1_b"], np.float32)
    w2 = np.asarray(params["conv2_w"], np.float32)     # (16, 6, 5, 5)
    b2 = np.asarray(params["conv2_b"], np.float32)
    fc1w = np.asarray(params["fc1_w"], np.float32)     # (120, 256)
    fc1b = np.asarray(params["fc1_b"], np.float32)
    fc2w = np.asarray(params["fc2_w"], np.float32)     # (84, 120)
    fc2b = np.asarray(params["fc2_b"], np.float32)
    fc3w = np.asarray(params["fc3_w"], np.float32)     # (10, 84)
    fc3b = np.asarray(params["fc3_b"], np.float32)

    # conv1: summing (rows @ band1[kh]) over kh gives, at lane b*128 + j*6 + c,
    # the conv1 output for channel c at output column 2j+b (W pool phase b).
    band1 = np.zeros((5, 28, 256), np.float32)
    for kh in range(5):
        for b in range(2):
            for j in range(12):
                for c in range(6):
                    for kw in range(5):
                        band1[kh, 2 * j + b + kw, b * 128 + j * 6 + c] = w1[c, 0, kh, kw]
    b1row = np.zeros((1, 128), np.float32)
    b1row[0, :72] = np.tile(b1, 12)                    # lane = j*6 + c

    # conv2: input lanes are (w, c_in) with c_in fastest (index xj*6 + c_in).
    band2 = np.zeros((5, 72, 256), np.float32)
    for kh in range(5):
        for b in range(2):
            for j2 in range(4):
                for c2 in range(16):
                    for c in range(6):
                        for kw in range(5):
                            band2[kh, (2 * j2 + b + kw) * 6 + c,
                                  b * 128 + j2 * 16 + c2] = w2[c2, c, kh, kw]
    b2row = np.zeros((1, 128), np.float32)
    b2row[0, :64] = np.tile(b2, 4)                     # lane = j2*16 + c2

    # fc1: fold PyTorch's (C, H, W) flatten order into the weight so the kernel
    # consumes the pooled (row = h, lane = (w, c)) activation directly.
    g1 = np.zeros((4, 64, 120), np.float32)
    for i2 in range(4):              # pooled h
        for j2 in range(4):          # pooled w
            for c2 in range(16):     # channel
                g1[i2, j2 * 16 + c2, :] = fc1w[:, c2 * 16 + i2 * 4 + j2]

    bf, f32 = jnp.bfloat16, jnp.float32
    packed = {
        "band1": (band1, bf), "b1row": (b1row, f32),
        "band2": (band2, bf), "b2row": (b2row, f32),
        "g1": (g1, bf), "fc1b": (fc1b[None, :], f32),
        "fc2w": (fc2w.T.copy(), bf), "fc2b": (fc2b[None, :], f32),
        "fc3w": (fc3w.T.copy(), bf), "fc3b": (fc3b[None, :], f32),
    }
    return {k: jnp.asarray(v, dtype=d) for k, (v, d) in packed.items()}


# ---------------------------------------------------------------------------
# Fused Pallas kernel: whole LeNet forward for a block of B samples per step
# ---------------------------------------------------------------------------
def _sigmoid(x):
    # EUP-friendly sigmoid: tanh runs on the transcendental unit.
    return 0.5 * jnp.tanh(0.5 * x) + 0.5


def _lenet_kernel(x_ref, band1_ref, b1row_ref, band2_ref, b2row_ref,
                  g1_ref, fc1b_ref, fc2w_ref, fc2b_ref, fc3w_ref, fc3b_ref,
                  out_ref):
    mm = functools.partial(jnp.dot, preferred_element_type=jnp.float32)
    bb = x_ref.shape[1]                                   # samples per grid step

    # x_ref layout: (28, B, 28) bf16 where row p*14 + t holds image row 2t + p
    # of every sample.  Row stack xs[s] = rows s, s+2, ..., s+22 of each sample,
    # stacked (pooled-row major, sample minor) as (12B, 28): a static
    # leading-dim slice plus a tile-aligned reshape (B % 16 == 0).
    def row_stack(s):
        start = (s % 2) * 14 + s // 2
        return x_ref[start:start + 12].reshape(12 * bb, 28)

    xs = [row_stack(s) for s in range(6)]

    # ---- conv1: banded matmuls, both W-pool phases from one matmul (N=2x128);
    #      2x2 max-pool taken on raw accumulators, then bias + sigmoid once. ---
    m1 = None
    for a in (0, 1):                                      # H pool phase
        acc = mm(xs[a], band1_ref[0])
        for kh in range(1, 5):
            acc = acc + mm(xs[a + kh], band1_ref[kh])
        m1 = acc if m1 is None else jnp.maximum(m1, acc)
    m1 = jnp.maximum(m1[:, :128], m1[:, 128:])            # W pool phases (aligned halves)
    p1 = _sigmoid(m1 + b1row_ref[...])[:, :72]            # (12B, 72) f32
    p1 = p1.astype(jnp.bfloat16).reshape(6, 2, bb, 72)    # [t, parity, n, (w, c)]

    # ---- conv2 + pool2 (same structure; row stacks sliced out of p1) --------
    ps = [p1[(s // 2):(s // 2) + 4, s % 2].reshape(4 * bb, 72) for s in range(6)]
    m2 = None
    for a in (0, 1):
        acc = mm(ps[a], band2_ref[0])
        for kh in range(1, 5):
            acc = acc + mm(ps[a + kh], band2_ref[kh])
        m2 = acc if m2 is None else jnp.maximum(m2, acc)
    m2 = jnp.maximum(m2[:, :128], m2[:, 128:])
    p2 = _sigmoid(m2 + b2row_ref[...])[:, :64]            # (4B, 64) f32
    p2 = p2.astype(jnp.bfloat16).reshape(4, bb, 64)       # [h, n, (w, c)]

    # ---- fc1 / fc2 / fc3 (flatten permutation already folded into g1) -------
    h = mm(p2[0], g1_ref[0])
    for i in range(1, 4):
        h = h + mm(p2[i], g1_ref[i])
    h = _sigmoid(h + fc1b_ref[...]).astype(jnp.bfloat16)                   # (B, 120)
    h = _sigmoid(mm(h, fc2w_ref[...]) + fc2b_ref[...]).astype(jnp.bfloat16)  # (B, 84)
    out_ref[...] = mm(h, fc3w_ref[...]) + fc3b_ref[...]                    # (B, 10) f32


def _const_index_map(ndim):
    return lambda i: (0,) * ndim


def _choose_block_batch(n, block_batch):
    b = min(block_batch, max(16, -(-n // 16) * 16))
    b = max(16, (b // 16) * 16)                # bf16 sublane-tile alignment
    # Keep >= 2 grid steps when the batch allows it (v7x has 2 TensorCores).
    while b > 16 and -(-n // b) < 2:
        b = max(16, ((b // 2) // 16) * 16)
    return b


def lenet_forward(packed, x_nchw, *, block_batch=64):
    n = x_nchw.shape[0]
    b = _choose_block_batch(n, block_batch)
    n_pad = -(-n // b) * b

    x = x_nchw.reshape(n, 28, 28).astype(jnp.float32)
    if n_pad != n:
        x = jnp.pad(x, ((0, n_pad - n), (0, 0), (0, 0)))
    # Parity-split layout: row p*14 + t of x_par holds image row 2t + p, so the
    # kernel's stride-2 row stacks are plain static slices (no selection
    # matmuls, no strided loads).  Matmul operands travel as bf16.
    x_par = (x.reshape(n_pad, 14, 2, 28).transpose(2, 1, 0, 3)
              .reshape(28, n_pad, 28).astype(jnp.bfloat16))

    weights = [packed[k] for k in _WEIGHT_ORDER]
    in_specs = [pl.BlockSpec((28, b, 28), lambda i: (0, i, 0))]
    for w in weights:
        in_specs.append(pl.BlockSpec(w.shape, _const_index_map(w.ndim)))

    out = pl.pallas_call(
        _lenet_kernel,
        out_shape=jax.ShapeDtypeStruct((n_pad, 10), jnp.float32),
        grid=(n_pad // b,),
        in_specs=in_specs,
        out_specs=pl.BlockSpec((b, 10), lambda i: (i, 0)),
        compiler_params=pltpu.CompilerParams(
            dimension_semantics=("parallel",),
            vmem_limit_bytes=32 * 1024 * 1024),
    )(x_par, *weights)
    return out[:n]


# ---------------------------------------------------------------------------
# Pure-JAX reference of the PyTorch module (for in-script verification)
# ---------------------------------------------------------------------------
def lenet_reference(params, x_nchw):
    dn = ("NCHW", "OIHW", "NCHW")

    def conv(x, w, b):
        y = jax.lax.conv_general_dilated(x, w, window_strides=(1, 1),
                                         padding="VALID", dimension_numbers=dn)
        return y + b[None, :, None, None]

    def pool(x):
        return jax.lax.reduce_window(x, -jnp.inf, jax.lax.max,
                                     (1, 1, 2, 2), (1, 1, 2, 2), "VALID")

    y = pool(jax.nn.sigmoid(conv(x_nchw, params["conv1_w"], params["conv1_b"])))
    y = pool(jax.nn.sigmoid(conv(y, params["conv2_w"], params["conv2_b"])))
    y = y.reshape(y.shape[0], -1)                         # (N, 256), (C,H,W) order
    y = jax.nn.sigmoid(y @ params["fc1_w"].T + params["fc1_b"])
    y = jax.nn.sigmoid(y @ params["fc2_w"].T + params["fc2_b"])
    return y @ params["fc3_w"].T + params["fc3_b"]


if __name__ == "__main__":
    key = jax.random.PRNGKey(0)
    pkey, xkey = jax.random.split(key)
    params = init_params(pkey)
    packed = pack_params(params)

    # 28x28 single-channel inputs (NCHW, like PyTorch) so the 16*4*4 flatten
    # holds.  block_batch=16 -> two grid steps, exercising the batched grid.
    x = jax.random.normal(xkey, (32, 1, 28, 28), jnp.float32)

    fwd = jax.jit(functools.partial(lenet_forward, block_batch=16))
    out = jax.block_until_ready(fwd(packed, x))
    assert out.shape == (32, 10) and out.dtype == jnp.float32

    ref = jax.block_until_ready(jax.jit(lenet_reference)(params, x))
    max_err = float(jnp.max(jnp.abs(out - ref)))
    if not bool(jnp.allclose(out, ref, atol=3e-2, rtol=3e-2)):
        raise SystemExit(f"Pallas output mismatch vs reference (max abs err {max_err:.3e})")

    print("KERNEL_OK")
</pallas_src>

<mosaic_0001>
module attributes {stable_mosaic.version = 11 : i64} {
  func.func @_lenet_kernel(%arg0: i32, %arg1: memref<28x16x28xbf16, #tpu.memory_space<vmem>>, %arg2: memref<5x28x256xbf16, #tpu.memory_space<vmem>>, %arg3: memref<1x128xf32, #tpu.memory_space<vmem>>, %arg4: memref<5x72x256xbf16, #tpu.memory_space<vmem>>, %arg5: memref<1x128xf32, #tpu.memory_space<vmem>>, %arg6: memref<4x64x120xbf16, #tpu.memory_space<vmem>>, %arg7: memref<1x120xf32, #tpu.memory_space<vmem>>, %arg8: memref<120x84xbf16, #tpu.memory_space<vmem>>, %arg9: memref<1x84xf32, #tpu.memory_space<vmem>>, %arg10: memref<84x10xbf16, #tpu.memory_space<vmem>>, %arg11: memref<1x10xf32, #tpu.memory_space<vmem>>, %arg12: memref<16x10xf32, #tpu.memory_space<vmem>>) attributes {dimension_semantics = [#tpu.dimension_semantics<parallel>], iteration_bounds = array<i64: 2>, scalar_prefetch = 0 : i64, scratch_operands = 0 : i64, tpu.core_type = #tpu.core_type<tc>, window_params = [{transform_indices = @transform_0, window_bounds = array<i64: 28, 16, 28>}, {pipeline_mode = #tpu.pipeline_mode<synchronous>, transform_indices = @transform_1, window_bounds = array<i64: 5, 28, 256>}, {pipeline_mode = #tpu.pipeline_mode<synchronous>, transform_indices = @transform_2, window_bounds = array<i64: 1, 128>}, {pipeline_mode = #tpu.pipeline_mode<synchronous>, transform_indices = @transform_3, window_bounds = array<i64: 5, 72, 256>}, {pipeline_mode = #tpu.pipeline_mode<synchronous>, transform_indices = @transform_4, window_bounds = array<i64: 1, 128>}, {pipeline_mode = #tpu.pipeline_mode<synchronous>, transform_indices = @transform_5, window_bounds = array<i64: 4, 64, 120>}, {pipeline_mode = #tpu.pipeline_mode<synchronous>, transform_indices = @transform_6, window_bounds = array<i64: 1, 120>}, {pipeline_mode = #tpu.pipeline_mode<synchronous>, transform_indices = @transform_7, window_bounds = array<i64: 120, 84>}, {pipeline_mode = #tpu.pipeline_mode<synchronous>, transform_indices = @transform_8, window_bounds = array<i64: 1, 84>}, {pipeline_mode = #tpu.pipeline_mode<synchronous>, transform_indices = @transform_9, window_bounds = array<i64: 84, 10>}, {pipeline_mode = #tpu.pipeline_mode<synchronous>, transform_indices = @transform_10, window_bounds = array<i64: 1, 10>}, {transform_indices = @transform_11, window_bounds = array<i64: 16, 10>}]} {
    %c0 = arith.constant 0 : index
    %c0_0 = arith.constant 0 : index
    %c0_1 = arith.constant 0 : index
    %0 = vector.load %arg1[%c0, %c0_0, %c0_1] : memref<28x16x28xbf16, #tpu.memory_space<vmem>>, vector<12x16x28xbf16>
    %1 = vector.shape_cast %0 : vector<12x16x28xbf16> to vector<192x28xbf16>
    %c14 = arith.constant 14 : index
    %c0_2 = arith.constant 0 : index
    %c0_3 = arith.constant 0 : index
    %2 = vector.load %arg1[%c14, %c0_2, %c0_3] : memref<28x16x28xbf16, #tpu.memory_space<vmem>>, vector<12x16x28xbf16>
    %3 = vector.shape_cast %2 : vector<12x16x28xbf16> to vector<192x28xbf16>
    %c1 = arith.constant 1 : index
    %c0_4 = arith.constant 0 : index
    %c0_5 = arith.constant 0 : index
    %4 = vector.load %arg1[%c1, %c0_4, %c0_5] : memref<28x16x28xbf16, #tpu.memory_space<vmem>>, vector<12x16x28xbf16>
    %5 = vector.shape_cast %4 : vector<12x16x28xbf16> to vector<192x28xbf16>
    %c15 = arith.constant 15 : index
    %c0_6 = arith.constant 0 : index
    %c0_7 = arith.constant 0 : index
    %6 = vector.load %arg1[%c15, %c0_6, %c0_7] : memref<28x16x28xbf16, #tpu.memory_space<vmem>>, vector<12x16x28xbf16>
    %7 = vector.shape_cast %6 : vector<12x16x28xbf16> to vector<192x28xbf16>
    %c2 = arith.constant 2 : index
    %c0_8 = arith.constant 0 : index
    %c0_9 = arith.constant 0 : index
    %8 = vector.load %arg1[%c2, %c0_8, %c0_9] : memref<28x16x28xbf16, #tpu.memory_space<vmem>>, vector<12x16x28xbf16>
    %9 = vector.shape_cast %8 : vector<12x16x28xbf16> to vector<192x28xbf16>
    %c16 = arith.constant 16 : index
    %c0_10 = arith.constant 0 : index
    %c0_11 = arith.constant 0 : index
    %10 = vector.load %arg1[%c16, %c0_10, %c0_11] : memref<28x16x28xbf16, #tpu.memory_space<vmem>>, vector<12x16x28xbf16>
    %11 = vector.shape_cast %10 : vector<12x16x28xbf16> to vector<192x28xbf16>
    %c0_12 = arith.constant 0 : index
    %c0_13 = arith.constant 0 : index
    %c0_14 = arith.constant 0 : index
    %12 = vector.load %arg2[%c0_12, %c0_13, %c0_14] : memref<5x28x256xbf16, #tpu.memory_space<vmem>>, vector<1x28x256xbf16>
    %13 = vector.shape_cast %12 : vector<1x28x256xbf16> to vector<28x256xbf16>
    %cst = arith.constant dense<0.000000e+00> : vector<192x256xf32>
    %14 = tpu.matmul %1, %13, %cst {dimension_numbers = #tpu.dot_dimension_numbers<[1], [0], [0], [1], [0, 0, 1, 1], [], []>} : vector<192x28xbf16>, vector<28x256xbf16>, vector<192x256xf32> -> vector<192x256xf32>
    %c1_15 = arith.constant 1 : index
    %c0_16 = arith.constant 0 : index
    %c0_17 = arith.constant 0 : index
    %15 = vector.load %arg2[%c1_15, %c0_16, %c0_17] : memref<5x28x256xbf16, #tpu.memory_space<vmem>>, vector<1x28x256xbf16>
    %16 = vector.shape_cast %15 : vector<1x28x256xbf16> to vector<28x256xbf16>
    %cst_18 = arith.constant dense<0.000000e+00> : vector<192x256xf32>
    %17 = tpu.matmul %3, %16, %cst_18 {dimension_numbers = #tpu.dot_dimension_numbers<[1], [0], [0], [1], [0, 0, 1, 1], [], []>} : vector<192x28xbf16>, vector<28x256xbf16>, vector<192x256xf32> -> vector<192x256xf32>
    %18 = arith.addf %14, %17 : vector<192x256xf32>
    %c2_19 = arith.constant 2 : index
    %c0_20 = arith.constant 0 : index
    %c0_21 = arith.constant 0 : index
    %19 = vector.load %arg2[%c2_19, %c0_20, %c0_21] : memref<5x28x256xbf16, #tpu.memory_space<vmem>>, vector<1x28x256xbf16>
    %20 = vector.shape_cast %19 : vector<1x28x256xbf16> to vector<28x256xbf16>
    %cst_22 = arith.constant dense<0.000000e+00> : vector<192x256xf32>
    %21 = tpu.matmul %5, %20, %cst_22 {dimension_numbers = #tpu.dot_dimension_numbers<[1], [0], [0], [1], [0, 0, 1, 1], [], []>} : vector<192x28xbf16>, vector<28x256xbf16>, vector<192x256xf32> -> vector<192x256xf32>
    %22 = arith.addf %18, %21 : vector<192x256xf32>
    %c3 = arith.constant 3 : index
    %c0_23 = arith.constant 0 : index
    %c0_24 = arith.constant 0 : index
    %23 = vector.load %arg2[%c3, %c0_23, %c0_24] : memref<5x28x256xbf16, #tpu.memory_space<vmem>>, vector<1x28x256xbf16>
    %24 = vector.shape_cast %23 : vector<1x28x256xbf16> to vector<28x256xbf16>
    %cst_25 = arith.constant dense<0.000000e+00> : vector<192x256xf32>
    %25 = tpu.matmul %7, %24, %cst_25 {dimension_numbers = #tpu.dot_dimension_numbers<[1], [0], [0], [1], [0, 0, 1, 1], [], []>} : vector<192x28xbf16>, vector<28x256xbf16>, vector<192x256xf32> -> vector<192x256xf32>
    %26 = arith.addf %22, %25 : vector<192x256xf32>
    %c4 = arith.constant 4 : index
    %c0_26 = arith.constant 0 : index
    %c0_27 = arith.constant 0 : index
    %27 = vector.load %arg2[%c4, %c0_26, %c0_27] : memref<5x28x256xbf16, #tpu.memory_space<vmem>>, vector<1x28x256xbf16>
    %28 = vector.shape_cast %27 : vector<1x28x256xbf16> to vector<28x256xbf16>
    %cst_28 = arith.constant dense<0.000000e+00> : vector<192x256xf32>
    %29 = tpu.matmul %9, %28, %cst_28 {dimension_numbers = #tpu.dot_dimension_numbers<[1], [0], [0], [1], [0, 0, 1, 1], [], []>} : vector<192x28xbf16>, vector<28x256xbf16>, vector<192x256xf32> -> vector<192x256xf32>
    %30 = arith.addf %26, %29 : vector<192x256xf32>
    %c0_29 = arith.constant 0 : index
    %c0_30 = arith.constant 0 : index
    %c0_31 = arith.constant 0 : index
    %31 = vector.load %arg2[%c0_29, %c0_30, %c0_31] : memref<5x28x256xbf16, #tpu.memory_space<vmem>>, vector<1x28x256xbf16>
    %32 = vector.shape_cast %31 : vector<1x28x256xbf16> to vector<28x256xbf16>
    %cst_32 = arith.constant dense<0.000000e+00> : vector<192x256xf32>
    %33 = tpu.matmul %3, %32, %cst_32 {dimension_numbers = #tpu.dot_dimension_numbers<[1], [0], [0], [1], [0, 0, 1, 1], [], []>} : vector<192x28xbf16>, vector<28x256xbf16>, vector<192x256xf32> -> vector<192x256xf32>
    %c1_33 = arith.constant 1 : index
    %c0_34 = arith.constant 0 : index
    %c0_35 = arith.constant 0 : index
    %34 = vector.load %arg2[%c1_33, %c0_34, %c0_35] : memref<5x28x256xbf16, #tpu.memory_space<vmem>>, vector<1x28x256xbf16>
    %35 = vector.shape_cast %34 : vector<1x28x256xbf16> to vector<28x256xbf16>
    %cst_36 = arith.constant dense<0.000000e+00> : vector<192x256xf32>
    %36 = tpu.matmul %5, %35, %cst_36 {dimension_numbers = #tpu.dot_dimension_numbers<[1], [0], [0], [1], [0, 0, 1, 1], [], []>} : vector<192x28xbf16>, vector<28x256xbf16>, vector<192x256xf32> -> vector<192x256xf32>
    %37 = arith.addf %33, %36 : vector<192x256xf32>
    %c2_37 = arith.constant 2 : index
    %c0_38 = arith.constant 0 : index
    %c0_39 = arith.constant 0 : index
    %38 = vector.load %arg2[%c2_37, %c0_38, %c0_39] : memref<5x28x256xbf16, #tpu.memory_space<vmem>>, vector<1x28x256xbf16>
    %39 = vector.shape_cast %38 : vector<1x28x256xbf16> to vector<28x256xbf16>
    %cst_40 = arith.constant dense<0.000000e+00> : vector<192x256xf32>
    %40 = tpu.matmul %7, %39, %cst_40 {dimension_numbers = #tpu.dot_dimension_numbers<[1], [0], [0], [1], [0, 0, 1, 1], [], []>} : vector<192x28xbf16>, vector<28x256xbf16>, vector<192x256xf32> -> vector<192x256xf32>
    %41 = arith.addf %37, %40 : vector<192x256xf32>
    %c3_41 = arith.constant 3 : index
    %c0_42 = arith.constant 0 : index
    %c0_43 = arith.constant 0 : index
    %42 = vector.load %arg2[%c3_41, %c0_42, %c0_43] : memref<5x28x256xbf16, #tpu.memory_space<vmem>>, vector<1x28x256xbf16>
    %43 = vector.shape_cast %42 : vector<1x28x256xbf16> to vector<28x256xbf16>
    %cst_44 = arith.constant dense<0.000000e+00> : vector<192x256xf32>
    %44 = tpu.matmul %9, %43, %cst_44 {dimension_numbers = #tpu.dot_dimension_numbers<[1], [0], [0], [1], [0, 0, 1, 1], [], []>} : vector<192x28xbf16>, vector<28x256xbf16>, vector<192x256xf32> -> vector<192x256xf32>
    %45 = arith.addf %41, %44 : vector<192x256xf32>
    %c4_45 = arith.constant 4 : index
    %c0_46 = arith.constant 0 : index
    %c0_47 = arith.constant 0 : index
    %46 = vector.load %arg2[%c4_45, %c0_46, %c0_47] : memref<5x28x256xbf16, #tpu.memory_space<vmem>>, vector<1x28x256xbf16>
    %47 = vector.shape_cast %46 : vector<1x28x256xbf16> to vector<28x256xbf16>
    %cst_48 = arith.constant dense<0.000000e+00> : vector<192x256xf32>
    %48 = tpu.matmul %11, %47, %cst_48 {dimension_numbers = #tpu.dot_dimension_numbers<[1], [0], [0], [1], [0, 0, 1, 1], [], []>} : vector<192x28xbf16>, vector<28x256xbf16>, vector<192x256xf32> -> vector<192x256xf32>
    %49 = arith.addf %45, %48 : vector<192x256xf32>
    %50 = arith.maximumf %30, %49 : vector<192x256xf32>
    %51 = vector.extract_strided_slice %50 {offsets = [0, 0], sizes = [192, 128], strides = [1, 1]} : vector<192x256xf32> to vector<192x128xf32>
    %52 = vector.extract_strided_slice %50 {offsets = [0, 128], sizes = [192, 128], strides = [1, 1]} : vector<192x256xf32> to vector<192x128xf32>
    %53 = arith.maximumf %51, %52 : vector<192x128xf32>
    %c0_49 = arith.constant 0 : index
    %c0_50 = arith.constant 0 : index
    %54 = vector.load %arg3[%c0_49, %c0_50] : memref<1x128xf32, #tpu.memory_space<vmem>>, vector<1x128xf32>
    %55 = vector.broadcast %54 : vector<1x128xf32> to vector<192x128xf32>
    %56 = arith.addf %53, %55 : vector<192x128xf32>
    %cst_51 = arith.constant 5.000000e-01 : f32
    %57 = vector.broadcast %cst_51 : f32 to vector<192x128xf32>
    %58 = arith.mulf %57, %56 : vector<192x128xf32>
    %59 = math.tanh %58 : vector<192x128xf32>
    %cst_52 = arith.constant 5.000000e-01 : f32
    %60 = vector.broadcast %cst_52 : f32 to vector<192x128xf32>
    %61 = arith.mulf %60, %59 : vector<192x128xf32>
    %cst_53 = arith.constant 5.000000e-01 : f32
    %62 = vector.broadcast %cst_53 : f32 to vector<192x128xf32>
    %63 = arith.addf %61, %62 : vector<192x128xf32>
    %64 = vector.extract_strided_slice %63 {offsets = [0, 0], sizes = [192, 72], strides = [1, 1]} : vector<192x128xf32> to vector<192x72xf32>
    %65 = arith.truncf %64 : vector<192x72xf32> to vector<192x72xbf16>
    %66 = vector.shape_cast %65 : vector<192x72xbf16> to vector<6x2x16x72xbf16>
    %67 = vector.extract_strided_slice %66 {offsets = [0, 0, 0, 0], sizes = [4, 1, 16, 72], strides = [1, 1, 1, 1]} : vector<6x2x16x72xbf16> to vector<4x1x16x72xbf16>
    %68 = vector.shape_cast %67 : vector<4x1x16x72xbf16> to vector<4x16x72xbf16>
    %69 = vector.shape_cast %68 : vector<4x16x72xbf16> to vector<64x72xbf16>
    %70 = vector.extract_strided_slice %66 {offsets = [0, 1, 0, 0], sizes = [4, 1, 16, 72], strides = [1, 1, 1, 1]} : vector<6x2x16x72xbf16> to vector<4x1x16x72xbf16>
    %71 = vector.shape_cast %70 : vector<4x1x16x72xbf16> to vector<4x16x72xbf16>
    %72 = vector.shape_cast %71 : vector<4x16x72xbf16> to vector<64x72xbf16>
    %73 = vector.extract_strided_slice %66 {offsets = [1, 0, 0, 0], sizes = [4, 1, 16, 72], strides = [1, 1, 1, 1]} : vector<6x2x16x72xbf16> to vector<4x1x16x72xbf16>
    %74 = vector.shape_cast %73 : vector<4x1x16x72xbf16> to vector<4x16x72xbf16>
    %75 = vector.shape_cast %74 : vector<4x16x72xbf16> to vector<64x72xbf16>
    %76 = vector.extract_strided_slice %66 {offsets = [1, 1, 0, 0], sizes = [4, 1, 16, 72], strides = [1, 1, 1, 1]} : vector<6x2x16x72xbf16> to vector<4x1x16x72xbf16>
    %77 = vector.shape_cast %76 : vector<4x1x16x72xbf16> to vector<4x16x72xbf16>
    %78 = vector.shape_cast %77 : vector<4x16x72xbf16> to vector<64x72xbf16>
    %79 = vector.extract_strided_slice %66 {offsets = [2, 0, 0, 0], sizes = [4, 1, 16, 72], strides = [1, 1, 1, 1]} : vector<6x2x16x72xbf16> to vector<4x1x16x72xbf16>
    %80 = vector.shape_cast %79 : vector<4x1x16x72xbf16> to vector<4x16x72xbf16>
    %81 = vector.shape_cast %80 : vector<4x16x72xbf16> to vector<64x72xbf16>
    %82 = vector.extract_strided_slice %66 {offsets = [2, 1, 0, 0], sizes = [4, 1, 16, 72], strides = [1, 1, 1, 1]} : vector<6x2x16x72xbf16> to vector<4x1x16x72xbf16>
    %83 = vector.shape_cast %82 : vector<4x1x16x72xbf16> to vector<4x16x72xbf16>
    %84 = vector.shape_cast %83 : vector<4x16x72xbf16> to vector<64x72xbf16>
    %c0_54 = arith.constant 0 : index
    %c0_55 = arith.constant 0 : index
    %c0_56 = arith.constant 0 : index
    %85 = vector.load %arg4[%c0_54, %c0_55, %c0_56] : memref<5x72x256xbf16, #tpu.memory_space<vmem>>, vector<1x72x256xbf16>
    %86 = vector.shape_cast %85 : vector<1x72x256xbf16> to vector<72x256xbf16>
    %cst_57 = arith.constant dense<0.000000e+00> : vector<64x256xf32>
    %87 = tpu.matmul %69, %86, %cst_57 {dimension_numbers = #tpu.dot_dimension_numbers<[1], [0], [0], [1], [0, 0, 1, 1], [], []>} : vector<64x72xbf16>, vector<72x256xbf16>, vector<64x256xf32> -> vector<64x256xf32>
    %c1_58 = arith.constant 1 : index
    %c0_59 = arith.constant 0 : index
    %c0_60 = arith.constant 0 : index
    %88 = vector.load %arg4[%c1_58, %c0_59, %c0_60] : memref<5x72x256xbf16, #tpu.memory_space<vmem>>, vector<1x72x256xbf16>
    %89 = vector.shape_cast %88 : vector<1x72x256xbf16> to vector<72x256xbf16>
    %cst_61 = arith.constant dense<0.000000e+00> : vector<64x256xf32>
    %90 = tpu.matmul %72, %89, %cst_61 {dimension_numbers = #tpu.dot_dimension_numbers<[1], [0], [0], [1], [0, 0, 1, 1], [], []>} : vector<64x72xbf16>, vector<72x256xbf16>, vector<64x256xf32> -> vector<64x256xf32>
    %91 = arith.addf %87, %90 : vector<64x256xf32>
    %c2_62 = arith.constant 2 : index
    %c0_63 = arith.constant 0 : index
    %c0_64 = arith.constant 0 : index
    %92 = vector.load %arg4[%c2_62, %c0_63, %c0_64] : memref<5x72x256xbf16, #tpu.memory_space<vmem>>, vector<1x72x256xbf16>
    %93 = vector.shape_cast %92 : vector<1x72x256xbf16> to vector<72x256xbf16>
    %cst_65 = arith.constant dense<0.000000e+00> : vector<64x256xf32>
    %94 = tpu.matmul %75, %93, %cst_65 {dimension_numbers = #tpu.dot_dimension_numbers<[1], [0], [0], [1], [0, 0, 1, 1], [], []>} : vector<64x72xbf16>, vector<72x256xbf16>, vector<64x256xf32> -> vector<64x256xf32>
    %95 = arith.addf %91, %94 : vector<64x256xf32>
    %c3_66 = arith.constant 3 : index
    %c0_67 = arith.constant 0 : index
    %c0_68 = arith.constant 0 : index
    %96 = vector.load %arg4[%c3_66, %c0_67, %c0_68] : memref<5x72x256xbf16, #tpu.memory_space<vmem>>, vector<1x72x256xbf16>
    %97 = vector.shape_cast %96 : vector<1x72x256xbf16> to vector<72x256xbf16>
    %cst_69 = arith.constant dense<0.000000e+00> : vector<64x256xf32>
    %98 = tpu.matmul %78, %97, %cst_69 {dimension_numbers = #tpu.dot_dimension_numbers<[1], [0], [0], [1], [0, 0, 1, 1], [], []>} : vector<64x72xbf16>, vector<72x256xbf16>, vector<64x256xf32> -> vector<64x256xf32>
    %99 = arith.addf %95, %98 : vector<64x256xf32>
    %c4_70 = arith.constant 4 : index
    %c0_71 = arith.constant 0 : index
    %c0_72 = arith.constant 0 : index
    %100 = vector.load %arg4[%c4_70, %c0_71, %c0_72] : memref<5x72x256xbf16, #tpu.memory_space<vmem>>, vector<1x72x256xbf16>
    %101 = vector.shape_cast %100 : vector<1x72x256xbf16> to vector<72x256xbf16>
    %cst_73 = arith.constant dense<0.000000e+00> : vector<64x256xf32>
    %102 = tpu.matmul %81, %101, %cst_73 {dimension_numbers = #tpu.dot_dimension_numbers<[1], [0], [0], [1], [0, 0, 1, 1], [], []>} : vector<64x72xbf16>, vector<72x256xbf16>, vector<64x256xf32> -> vector<64x256xf32>
    %103 = arith.addf %99, %102 : vector<64x256xf32>
    %c0_74 = arith.constant 0 : index
    %c0_75 = arith.constant 0 : index
    %c0_76 = arith.constant 0 : index
    %104 = vector.load %arg4[%c0_74, %c0_75, %c0_76] : memref<5x72x256xbf16, #tpu.memory_space<vmem>>, vector<1x72x256xbf16>
    %105 = vector.shape_cast %104 : vector<1x72x256xbf16> to vector<72x256xbf16>
    %cst_77 = arith.constant dense<0.000000e+00> : vector<64x256xf32>
    %106 = tpu.matmul %72, %105, %cst_77 {dimension_numbers = #tpu.dot_dimension_numbers<[1], [0], [0], [1], [0, 0, 1, 1], [], []>} : vector<64x72xbf16>, vector<72x256xbf16>, vector<64x256xf32> -> vector<64x256xf32>
    %c1_78 = arith.constant 1 : index
    %c0_79 = arith.constant 0 : index
    %c0_80 = arith.constant 0 : index
    %107 = vector.load %arg4[%c1_78, %c0_79, %c0_80] : memref<5x72x256xbf16, #tpu.memory_space<vmem>>, vector<1x72x256xbf16>
    %108 = vector.shape_cast %107 : vector<1x72x256xbf16> to vector<72x256xbf16>
    %cst_81 = arith.constant dense<0.000000e+00> : vector<64x256xf32>
    %109 = tpu.matmul %75, %108, %cst_81 {dimension_numbers = #tpu.dot_dimension_numbers<[1], [0], [0], [1], [0, 0, 1, 1], [], []>} : vector<64x72xbf16>, vector<72x256xbf16>, vector<64x256xf32> -> vector<64x256xf32>
    %110 = arith.addf %106, %109 : vector<64x256xf32>
    %c2_82 = arith.constant 2 : index
    %c0_83 = arith.constant 0 : index
    %c0_84 = arith.constant 0 : index
    %111 = vector.load %arg4[%c2_82, %c0_83, %c0_84] : memref<5x72x256xbf16, #tpu.memory_space<vmem>>, vector<1x72x256xbf16>
    %112 = vector.shape_cast %111 : vector<1x72x256xbf16> to vector<72x256xbf16>
    %cst_85 = arith.constant dense<0.000000e+00> : vector<64x256xf32>
    %113 = tpu.matmul %78, %112, %cst_85 {dimension_numbers = #tpu.dot_dimension_numbers<[1], [0], [0], [1], [0, 0, 1, 1], [], []>} : vector<64x72xbf16>, vector<72x256xbf16>, vector<64x256xf32> -> vector<64x256xf32>
    %114 = arith.addf %110, %113 : vector<64x256xf32>
    %c3_86 = arith.constant 3 : index
    %c0_87 = arith.constant 0 : index
    %c0_88 = arith.constant 0 : index
    %115 = vector.load %arg4[%c3_86, %c0_87, %c0_88] : memref<5x72x256xbf16, #tpu.memory_space<vmem>>, vector<1x72x256xbf16>
    %116 = vector.shape_cast %115 : vector<1x72x256xbf16> to vector<72x256xbf16>
    %cst_89 = arith.constant dense<0.000000e+00> : vector<64x256xf32>
    %117 = tpu.matmul %81, %116, %cst_89 {dimension_numbers = #tpu.dot_dimension_numbers<[1], [0], [0], [1], [0, 0, 1, 1], [], []>} : vector<64x72xbf16>, vector<72x256xbf16>, vector<64x256xf32> -> vector<64x256xf32>
    %118 = arith.addf %114, %117 : vector<64x256xf32>
    %c4_90 = arith.constant 4 : index
    %c0_91 = arith.constant 0 : index
    %c0_92 = arith.constant 0 : index
    %119 = vector.load %arg4[%c4_90, %c0_91, %c0_92] : memref<5x72x256xbf16, #tpu.memory_space<vmem>>, vector<1x72x256xbf16>
    %120 = vector.shape_cast %119 : vector<1x72x256xbf16> to vector<72x256xbf16>
    %cst_93 = arith.constant dense<0.000000e+00> : vector<64x256xf32>
    %121 = tpu.matmul %84, %120, %cst_93 {dimension_numbers = #tpu.dot_dimension_numbers<[1], [0], [0], [1], [0, 0, 1, 1], [], []>} : vector<64x72xbf16>, vector<72x256xbf16>, vector<64x256xf32> -> vector<64x256xf32>
    %122 = arith.addf %118, %121 : vector<64x256xf32>
    %123 = arith.maximumf %103, %122 : vector<64x256xf32>
    %124 = vector.extract_strided_slice %123 {offsets = [0, 0], sizes = [64, 128], strides = [1, 1]} : vector<64x256xf32> to vector<64x128xf32>
    %125 = vector.extract_strided_slice %123 {offsets = [0, 128], sizes = [64, 128], strides = [1, 1]} : vector<64x256xf32> to vector<64x128xf32>
    %126 = arith.maximumf %124, %125 : vector<64x128xf32>
    %c0_94 = arith.constant 0 : index
    %c0_95 = arith.constant 0 : index
    %127 = vector.load %arg5[%c0_94, %c0_95] : memref<1x128xf32, #tpu.memory_space<vmem>>, vector<1x128xf32>
    %128 = vector.broadcast %127 : vector<1x128xf32> to vector<64x128xf32>
    %129 = arith.addf %126, %128 : vector<64x128xf32>
    %cst_96 = arith.constant 5.000000e-01 : f32
    %130 = vector.broadcast %cst_96 : f32 to vector<64x128xf32>
    %131 = arith.mulf %130, %129 : vector<64x128xf32>
    %132 = math.tanh %131 : vector<64x128xf32>
    %cst_97 = arith.constant 5.000000e-01 : f32
    %133 = vector.broadcast %cst_97 : f32 to vector<64x128xf32>
    %134 = arith.mulf %133, %132 : vector<64x128xf32>
    %cst_98 = arith.constant 5.000000e-01 : f32
    %135 = vector.broadcast %cst_98 : f32 to vector<64x128xf32>
    %136 = arith.addf %134, %135 : vector<64x128xf32>
    %137 = vector.extract_strided_slice %136 {offsets = [0, 0], sizes = [64, 64], strides = [1, 1]} : vector<64x128xf32> to vector<64x64xf32>
    %138 = arith.truncf %137 : vector<64x64xf32> to vector<64x64xbf16>
    %139 = vector.shape_cast %138 : vector<64x64xbf16> to vector<4x16x64xbf16>
    %140 = vector.extract_strided_slice %139 {offsets = [0, 0, 0], sizes = [1, 16, 64], strides = [1, 1, 1]} : vector<4x16x64xbf16> to vector<1x16x64xbf16>
    %141 = vector.shape_cast %140 : vector<1x16x64xbf16> to vector<16x64xbf16>
    %c0_99 = arith.constant 0 : index
    %c0_100 = arith.constant 0 : index
    %c0_101 = arith.constant 0 : index
    %142 = vector.load %arg6[%c0_99, %c0_100, %c0_101] : memref<4x64x120xbf16, #tpu.memory_space<vmem>>, vector<1x64x120xbf16>
    %143 = vector.shape_cast %142 : vector<1x64x120xbf16> to vector<64x120xbf16>
    %cst_102 = arith.constant dense<0.000000e+00> : vector<16x120xf32>
    %144 = tpu.matmul %141, %143, %cst_102 {dimension_numbers = #tpu.dot_dimension_numbers<[1], [0], [0], [1], [0, 0, 1, 1], [], []>} : vector<16x64xbf16>, vector<64x120xbf16>, vector<16x120xf32> -> vector<16x120xf32>
    %145 = vector.extract_strided_slice %139 {offsets = [1, 0, 0], sizes = [1, 16, 64], strides = [1, 1, 1]} : vector<4x16x64xbf16> to vector<1x16x64xbf16>
    %146 = vector.shape_cast %145 : vector<1x16x64xbf16> to vector<16x64xbf16>
    %c1_103 = arith.constant 1 : index
    %c0_104 = arith.constant 0 : index
    %c0_105 = arith.constant 0 : index
    %147 = vector.load %arg6[%c1_103, %c0_104, %c0_105] : memref<4x64x120xbf16, #tpu.memory_space<vmem>>, vector<1x64x120xbf16>
    %148 = vector.shape_cast %147 : vector<1x64x120xbf16> to vector<64x120xbf16>
    %cst_106 = arith.constant dense<0.000000e+00> : vector<16x120xf32>
    %149 = tpu.matmul %146, %148, %cst_106 {dimension_numbers = #tpu.dot_dimension_numbers<[1], [0], [0], [1], [0, 0, 1, 1], [], []>} : vector<16x64xbf16>, vector<64x120xbf16>, vector<16x120xf32> -> vector<16x120xf32>
    %150 = arith.addf %144, %149 : vector<16x120xf32>
    %151 = vector.extract_strided_slice %139 {offsets = [2, 0, 0], sizes = [1, 16, 64], strides = [1, 1, 1]} : vector<4x16x64xbf16> to vector<1x16x64xbf16>
    %152 = vector.shape_cast %151 : vector<1x16x64xbf16> to vector<16x64xbf16>
    %c2_107 = arith.constant 2 : index
    %c0_108 = arith.constant 0 : index
    %c0_109 = arith.constant 0 : index
    %153 = vector.load %arg6[%c2_107, %c0_108, %c0_109] : memref<4x64x120xbf16, #tpu.memory_space<vmem>>, vector<1x64x120xbf16>
    %154 = vector.shape_cast %153 : vector<1x64x120xbf16> to vector<64x120xbf16>
    %cst_110 = arith.constant dense<0.000000e+00> : vector<16x120xf32>
    %155 = tpu.matmul %152, %154, %cst_110 {dimension_numbers = #tpu.dot_dimension_numbers<[1], [0], [0], [1], [0, 0, 1, 1], [], []>} : vector<16x64xbf16>, vector<64x120xbf16>, vector<16x120xf32> -> vector<16x120xf32>
    %156 = arith.addf %150, %155 : vector<16x120xf32>
    %157 = vector.extract_strided_slice %139 {offsets = [3, 0, 0], sizes = [1, 16, 64], strides = [1, 1, 1]} : vector<4x16x64xbf16> to vector<1x16x64xbf16>
    %158 = vector.shape_cast %157 : vector<1x16x64xbf16> to vector<16x64xbf16>
    %c3_111 = arith.constant 3 : index
    %c0_112 = arith.constant 0 : index
    %c0_113 = arith.constant 0 : index
    %159 = vector.load %arg6[%c3_111, %c0_112, %c0_113] : memref<4x64x120xbf16, #tpu.memory_space<vmem>>, vector<1x64x120xbf16>
    %160 = vector.shape_cast %159 : vector<1x64x120xbf16> to vector<64x120xbf16>
    %cst_114 = arith.constant dense<0.000000e+00> : vector<16x120xf32>
    %161 = tpu.matmul %158, %160, %cst_114 {dimension_numbers = #tpu.dot_dimension_numbers<[1], [0], [0], [1], [0, 0, 1, 1], [], []>} : vector<16x64xbf16>, vector<64x120xbf16>, vector<16x120xf32> -> vector<16x120xf32>
    %162 = arith.addf %156, %161 : vector<16x120xf32>
    %c0_115 = arith.constant 0 : index
    %c0_116 = arith.constant 0 : index
    %163 = vector.load %arg7[%c0_115, %c0_116] : memref<1x120xf32, #tpu.memory_space<vmem>>, vector<1x120xf32>
    %164 = vector.broadcast %163 : vector<1x120xf32> to vector<16x120xf32>
    %165 = arith.addf %162, %164 : vector<16x120xf32>
    %cst_117 = arith.constant 5.000000e-01 : f32
    %166 = vector.broadcast %cst_117 : f32 to vector<16x120xf32>
    %167 = arith.mulf %166, %165 : vector<16x120xf32>
    %168 = math.tanh %167 : vector<16x120xf32>
    %cst_118 = arith.constant 5.000000e-01 : f32
    %169 = vector.broadcast %cst_118 : f32 to vector<16x120xf32>
    %170 = arith.mulf %169, %168 : vector<16x120xf32>
    %cst_119 = arith.constant 5.000000e-01 : f32
    %171 = vector.broadcast %cst_119 : f32 to vector<16x120xf32>
    %172 = arith.addf %170, %171 : vector<16x120xf32>
    %173 = arith.truncf %172 : vector<16x120xf32> to vector<16x120xbf16>
    %c0_120 = arith.constant 0 : index
    %c0_121 = arith.constant 0 : index
    %174 = vector.load %arg8[%c0_120, %c0_121] : memref<120x84xbf16, #tpu.memory_space<vmem>>, vector<120x84xbf16>
    %cst_122 = arith.constant dense<0.000000e+00> : vector<16x84xf32>
    %175 = tpu.matmul %173, %174, %cst_122 {dimension_numbers = #tpu.dot_dimension_numbers<[1], [0], [0], [1], [0, 0, 1, 1], [], []>} : vector<16x120xbf16>, vector<120x84xbf16>, vector<16x84xf32> -> vector<16x84xf32>
    %c0_123 = arith.constant 0 : index
    %c0_124 = arith.constant 0 : index
    %176 = vector.load %arg9[%c0_123, %c0_124] : memref<1x84xf32, #tpu.memory_space<vmem>>, vector<1x84xf32>
    %177 = vector.broadcast %176 : vector<1x84xf32> to vector<16x84xf32>
    %178 = arith.addf %175, %177 : vector<16x84xf32>
    %cst_125 = arith.constant 5.000000e-01 : f32
    %179 = vector.broadcast %cst_125 : f32 to vector<16x84xf32>
    %180 = arith.mulf %179, %178 : vector<16x84xf32>
    %181 = math.tanh %180 : vector<16x84xf32>
    %cst_126 = arith.constant 5.000000e-01 : f32
    %182 = vector.broadcast %cst_126 : f32 to vector<16x84xf32>
    %183 = arith.mulf %182, %181 : vector<16x84xf32>
    %cst_127 = arith.constant 5.000000e-01 : f32
    %184 = vector.broadcast %cst_127 : f32 to vector<16x84xf32>
    %185 = arith.addf %183, %184 : vector<16x84xf32>
    %186 = arith.truncf %185 : vector<16x84xf32> to vector<16x84xbf16>
    %c0_128 = arith.constant 0 : index
    %c0_129 = arith.constant 0 : index
    %187 = vector.load %arg10[%c0_128, %c0_129] : memref<84x10xbf16, #tpu.memory_space<vmem>>, vector<84x10xbf16>
    %cst_130 = arith.constant dense<0.000000e+00> : vector<16x10xf32>
    %188 = tpu.matmul %186, %187, %cst_130 {dimension_numbers = #tpu.dot_dimension_numbers<[1], [0], [0], [1], [0, 0, 1, 1], [], []>} : vector<16x84xbf16>, vector<84x10xbf16>, vector<16x10xf32> -> vector<16x10xf32>
    %c0_131 = arith.constant 0 : index
    %c0_132 = arith.constant 0 : index
    %189 = vector.load %arg11[%c0_131, %c0_132] : memref<1x10xf32, #tpu.memory_space<vmem>>, vector<1x10xf32>
    %190 = vector.broadcast %189 : vector<1x10xf32> to vector<16x10xf32>
    %191 = arith.addf %188, %190 : vector<16x10xf32>
    %c0_133 = arith.constant 0 : index
    %c0_134 = arith.constant 0 : index
    %192 = vector.load %arg12[%c0_133, %c0_134] : memref<16x10xf32, #tpu.memory_space<vmem>>, vector<16x10xf32>
    tpu.vector_store %arg12[%c0_133, %c0_134], %191 {strides = array<i32>} : memref<16x10xf32, #tpu.memory_space<vmem>>, vector<16x10xf32>,
    return
  }
  func.func @transform_0(%arg0: i32) -> (i32, i32, i32) {
    %c0_i32 = arith.constant 0 : i32
    %c0_i32_0 = arith.constant 0 : i32
    %c0_i32_1 = arith.constant 0 : i32
    return %c0_i32, %arg0, %c0_i32_0 : i32, i32, i32
  }
  func.func @transform_1(%arg0: i32) -> (i32, i32, i32) {
    %c0_i32 = arith.constant 0 : i32
    %c0_i32_0 = arith.constant 0 : i32
    %c0_i32_1 = arith.constant 0 : i32
    %c0_i32_2 = arith.constant 0 : i32
    return %c0_i32, %c0_i32_0, %c0_i32_1 : i32, i32, i32
  }
  func.func @transform_2(%arg0: i32) -> (i32, i32) {
    %c0_i32 = arith.constant 0 : i32
    %c0_i32_0 = arith.constant 0 : i32
    %c0_i32_1 = arith.constant 0 : i32
    return %c0_i32, %c0_i32_0 : i32, i32
  }
  func.func @transform_3(%arg0: i32) -> (i32, i32, i32) {
    %c0_i32 = arith.constant 0 : i32
    %c0_i32_0 = arith.constant 0 : i32
    %c0_i32_1 = arith.constant 0 : i32
    %c0_i32_2 = arith.constant 0 : i32
    return %c0_i32, %c0_i32_0, %c0_i32_1 : i32, i32, i32
  }
  func.func @transform_4(%arg0: i32) -> (i32, i32) {
    %c0_i32 = arith.constant 0 : i32
    %c0_i32_0 = arith.constant 0 : i32
    %c0_i32_1 = arith.constant 0 : i32
    return %c0_i32, %c0_i32_0 : i32, i32
  }
  func.func @transform_5(%arg0: i32) -> (i32, i32, i32) {
    %c0_i32 = arith.constant 0 : i32
    %c0_i32_0 = arith.constant 0 : i32
    %c0_i32_1 = arith.constant 0 : i32
    %c0_i32_2 = arith.constant 0 : i32
    return %c0_i32, %c0_i32_0, %c0_i32_1 : i32, i32, i32
  }
  func.func @transform_6(%arg0: i32) -> (i32, i32) {
    %c0_i32 = arith.constant 0 : i32
    %c0_i32_0 = arith.constant 0 : i32
    %c0_i32_1 = arith.constant 0 : i32
    return %c0_i32, %c0_i32_0 : i32, i32
  }
  func.func @transform_7(%arg0: i32) -> (i32, i32) {
    %c0_i32 = arith.constant 0 : i32
    %c0_i32_0 = arith.constant 0 : i32
    %c0_i32_1 = arith.constant 0 : i32
    return %c0_i32, %c0_i32_0 : i32, i32
  }
  func.func @transform_8(%arg0: i32) -> (i32, i32) {
    %c0_i32 = arith.constant 0 : i32
    %c0_i32_0 = arith.constant 0 : i32
    %c0_i32_1 = arith.constant 0 : i32
    return %c0_i32, %c0_i32_0 : i32, i32
  }
  func.func @transform_9(%arg0: i32) -> (i32, i32) {
    %c0_i32 = arith.constant 0 : i32
    %c0_i32_0 = arith.constant 0 : i32
    %c0_i32_1 = arith.constant 0 : i32
    return %c0_i32, %c0_i32_0 : i32, i32
  }
  func.func @transform_10(%arg0: i32) -> (i32, i32) {
    %c0_i32 = arith.constant 0 : i32
    %c0_i32_0 = arith.constant 0 : i32
    %c0_i32_1 = arith.constant 0 : i32
    return %c0_i32, %c0_i32_0 : i32, i32
  }
  func.func @transform_11(%arg0: i32) -> (i32, i32) {
    %c0_i32 = arith.constant 0 : i32
    %c0_i32_0 = arith.constant 0 : i32
    return %arg0, %c0_i32 : i32, i32
  }
}

</mosaic_0001>

<bundles_post_ra>
// kernel: lenet_forward.1
= control target key start
LH: loop header
LB: loop body
LE: loop exit
PB: predicated region body
PF: predicated region fallthrough
CT: control target
= control target key end

     0   :  { %s7007_s17 = smov 0   ;;  %s7009_s18 = smov 0   ;;  %s8194_s0 = inlined_call_operand.vmem [shape: bf16[28,32,28], index: 0, kind: input, shape index: {}]   ;;  %s8195_s1 = inlined_call_operand.vmem [shape: bf16[5,28,256], index: 1, kind: input, shape index: {}]   ;;  %s8196_s2 = inlined_call_operand.vmem [shape: f32[1,128], index: 2, kind: input, shape index: {}]   ;;  %s8197_s3 = inlined_call_operand.vmem [shape: bf16[5,72,256], index: 3, kind: input, shape index: {}]   ;;  %s8198_s4 = inlined_call_operand.vmem [shape: f32[1,128], index: 4, kind: input, shape index: {}]   ;;  %s8199_s5 = inlined_call_operand.vmem [shape: bf16[4,64,120], index: 5, kind: input, shape index: {}]   ;;  %s8200_s6 = inlined_call_operand.vmem [shape: f32[1,120], index: 6, kind: input, shape index: {}]   ;;  %s8201_s7 = inlined_call_operand.vmem [shape: bf16[120,84], index: 7, kind: input, shape index: {}]   ;;  %s8202_s8 = inlined_call_operand.vmem [shape: f32[1,84], index: 8, kind: input, shape index: {}]   ;;  %s8203_s9 = inlined_call_operand.vmem [shape: bf16[84,10], index: 9, kind: input, shape index: {}]   ;;  %s8204_s10 = inlined_call_operand.vmem [shape: f32[1,10], index: 10, kind: input, shape index: {}]   ;;  %s8205_s11 = inlined_call_operand.vmem [shape: f32[32,10], index: 11, kind: output, shape index: {}]  }
   0x1   :  { %s7011_s19 = smov 0  }
   0x2 LB: > { %s5414_s20 = sadd.s32 4294967295, %s6942_s19   ;;  %s7024_s21 = sadd.s32 1, %s6942_s19   ;;  %s6942_s19 = sphi %s7011_s19, %s8208_s19   ;;  %s6938_s18 = sphi %s7009_s18, %s8207_s18   ;;  %s6934_s17 = sphi %s7007_s17, %s8206_s17  }
   0x3   : > { %s25_s22 = ssub.s32 %s6942_s19, %s7024_s21  ;;  %s28_s23 = sadd.s32 1, %s6938_s18 }
   0x4   : > { %p26_p0 = scmp.eq.s32.totalorder %s25_s22, 0  ;;  %p35_p1 = scmp.ne.s32.totalorder %s6938_s18, %s6934_s17 }
   0x5   : > { %p36_p2 = scmp.eq.s32.totalorder %s6942_s19, 0  ;;  %p5417_p4 = scmp.ge.s32.totalorder %s6942_s19, 2 }
   0x6   : > { %s7033_s24 = scalar_select %p26_p0, %s6938_s18, %s28_s23  }
   0x7   : > { %p37_p3 = por %p36_p2, %p35_p1  ;;  %327 = sbr.rel (%p5417_p4) target bundleno = 32 (0x20), region = 56 }
   0xe   : > { %330 = sbr.rel (!%p37_p3) target bundleno = 32 (0x20), region = 60  ;;  %s332_s25 = sand.u32 (%p37_p3), 1, %s6938_s18  }
   0xf   : > { %s5984_s26 = sshll.u32 (%p37_p3), %s6942_s19, 3  ;;  %s6617_s27 = smul.u32 (%p37_p3), 224, %s332_s25 }
  0x10   : > { %s7041_s30 = scalar_lea.vmem (%p37_p3), %s8194_s0, %s5984_s26 }
  0x11   : > { %v353_v0 = vld [vmem:[%s7041_s30] sm:$0xff] (%p37_p3)   ;;  %v357_v1 = vld [vmem:[%s7041_s30 + $0x10] sm:$0xff] (%p37_p3)   ;;  %s7049_s12 = scalar_lea.vmem (%p37_p3), [#allocation2], %s6617_s27 }
  0x12   : > { %v361_v2 = vld [vmem:[%s7041_s30 + $0x20] sm:$0xff] (%p37_p3)   ;;  %v365_v3 = vld [vmem:[%s7041_s30 + $0x30] sm:$0xff] (%p37_p3)   ;;  %354 = vst [vmem:[%s7049_s12] sm:$0xff] (%p37_p3), %v353_v0   ;;  %358 = vst [vmem:[%s7049_s12 + $0x8] sm:$0xff] (%p37_p3), %v357_v1  }
  0x13   : > { %v369_v4 = vld [vmem:[%s7041_s30 + $0x40] sm:$0xff] (%p37_p3)   ;;  %v373_v5 = vld [vmem:[%s7041_s30 + $0x50] sm:$0xff] (%p37_p3)   ;;  %362 = vst [vmem:[%s7049_s12 + $0x10] sm:$0xff] (%p37_p3), %v361_v2   ;;  %366 = vst [vmem:[%s7049_s12 + $0x18] sm:$0xff] (%p37_p3), %v365_v3  }
  0x14   : > { %370 = vst [vmem:[%s7049_s12 + $0x20] sm:$0xff] (%p37_p3), %v369_v4   ;;  %374 = vst [vmem:[%s7049_s12 + $0x28] sm:$0xff] (%p37_p3), %v373_v5   ;;  %v377_v6 = vld [vmem:[%s7041_s30 + $0x60] sm:$0xff] (%p37_p3)   ;;  %v381_v7 = vld [vmem:[%s7041_s30 + $0x70] sm:$0xff] (%p37_p3)  }
  0x15   : > { %v385_v8 = vld [vmem:[%s7041_s30 + $0x80] sm:$0xff]   ;;  %378 = vst [vmem:[%s7049_s12 + $0x30] sm:$0xff] %v377_v6   ;;  %382 = vst [vmem:[%s7049_s12 + $0x38] sm:$0xff] %v381_v7   ;;  %v389_v9 = vld [vmem:[%s7041_s30 + $0x90] sm:$0xff]  }
  0x16   : > { %386 = vst [vmem:[%s7049_s12 + $0x40] sm:$0xff] %v385_v8   ;;  %v393_v10 = vld [vmem:[%s7041_s30 + $0xa0] sm:$0xff]   ;;  %v397_v11 = vld [vmem:[%s7041_s30 + $0xb0] sm:$0xff]   ;;  %390 = vst [vmem:[%s7049_s12 + $0x48] sm:$0xff] %v389_v9  }
  0x17   : > { %394 = vst [vmem:[%s7049_s12 + $0x50] sm:$0xff] %v393_v10   ;;  %398 = vst [vmem:[%s7049_s12 + $0x58] sm:$0xff] %v397_v11   ;;  %v401_v12 = vld [vmem:[%s7041_s30 + $0xc0] sm:$0xff]   ;;  %v405_v13 = vld [vmem:[%s7041_s30 + $0xd0] sm:$0xff]  }
  0x18   : > { %v409_v14 = vld [vmem:[%s7041_s30 + $0xe0] sm:$0xff]   ;;  %402 = vst [vmem:[%s7049_s12 + $0x60] sm:$0xff] %v401_v12   ;;  %406 = vst [vmem:[%s7049_s12 + $0x68] sm:$0xff] %v405_v13   ;;  %v413_v15 = vld [vmem:[%s7041_s30 + $0xf0] sm:$0xff]  }
  0x19   : > { %410 = vst [vmem:[%s7049_s12 + $0x70] sm:$0xff] %v409_v14   ;;  %v417_v16 = vld [vmem:[%s7041_s30 + $0x100] sm:$0xff]   ;;  %v421_v17 = vld [vmem:[%s7041_s30 + $0x110] sm:$0xff]   ;;  %414 = vst [vmem:[%s7049_s12 + $0x78] sm:$0xff] %v413_v15  }
  0x1a   : > { %418 = vst [vmem:[%s7049_s12 + $0x80] sm:$0xff] %v417_v16   ;;  %422 = vst [vmem:[%s7049_s12 + $0x88] sm:$0xff] %v421_v17   ;;  %v425_v18 = vld [vmem:[%s7041_s30 + $0x120] sm:$0xff]   ;;  %v429_v19 = vld [vmem:[%s7041_s30 + $0x130] sm:$0xff]  }
  0x1b   : > { %v433_v20 = vld [vmem:[%s7041_s30 + $0x140] sm:$0xff]   ;;  %426 = vst [vmem:[%s7049_s12 + $0x90] sm:$0xff] %v425_v18   ;;  %430 = vst [vmem:[%s7049_s12 + $0x98] sm:$0xff] %v429_v19   ;;  %v437_v21 = vld [vmem:[%s7041_s30 + $0x150] sm:$0xff]  }
  0x1c   : > { %434 = vst [vmem:[%s7049_s12 + $0xa0] sm:$0xff] %v433_v20   ;;  %v441_v22 = vld [vmem:[%s7041_s30 + $0x160] sm:$0xff]   ;;  %v445_v23 = vld [vmem:[%s7041_s30 + $0x170] sm:$0xff]   ;;  %438 = vst [vmem:[%s7049_s12 + $0xa8] sm:$0xff] %v437_v21  }
  0x1d   : > { %442 = vst [vmem:[%s7049_s12 + $0xb0] sm:$0xff] %v441_v22   ;;  %446 = vst [vmem:[%s7049_s12 + $0xb8] sm:$0xff] %v445_v23   ;;  %v449_v24 = vld [vmem:[%s7041_s30 + $0x180] sm:$0xff]   ;;  %v453_v25 = vld [vmem:[%s7041_s30 + $0x190] sm:$0xff]  }
  0x1e   : > { %v457_v26 = vld [vmem:[%s7041_s30 + $0x1a0] sm:$0xff]   ;;  %450 = vst [vmem:[%s7049_s12 + $0xc0] sm:$0xff] %v449_v24   ;;  %454 = vst [vmem:[%s7049_s12 + $0xc8] sm:$0xff] %v453_v25   ;;  %v461_v27 = vld [vmem:[%s7041_s30 + $0x1b0] sm:$0xff]  }
  0x1f   : > { %458 = vst [vmem:[%s7049_s12 + $0xd0] sm:$0xff] %v457_v26   ;;  %462 = vst [vmem:[%s7049_s12 + $0xd8] sm:$0xff] %v461_v27  }
  0x20 PF: > { %p5420_p5 = scmp.ge.s32.totalorder %s6942_s19, 1  ;;  %p598_p6 = scmp.lt.s32.totalorder %s6942_s19, 3 }
  0x22   : > { %p599_p7 = pnand %p5420_p5, %p598_p6 }
  0x23   : > { %v6646_v28 = vld [vmem:[%s8195_s1 + $0x24] ss:$8 sps:$4 sm:$0xff] (!%p599_p7)   ;;  %vm925_vm0 = vcmask (!%p599_p7), 1045504   ;;  %v6648_v29 = vld [vmem:[%s8195_s1 + $0x20] ss:$8 sps:$4 sm:$0xff] (!%p599_p7)   ;;  %v6944_v30 = vmov (!%p599_p7), 0  }
  0x24   : > { %602 = sbr.rel (%p599_p7) target bundleno = 1792 (0x700), region = 101  ;;  %964 = vmatprep.mubr.bf16.mxu0 (!%p599_p7), %v6944_v30  ;;  %2368 = vmatprep.mubr.bf16.mxu1 (!%p599_p7), %v6944_v30  ;;  %s605_s22 = sand.u32 (!%p599_p7), 1, %s6934_s17   ;;  %v6649_v31 = vld [vmem:[%s8195_s1 + $0x34] ss:$8 sps:$4 sm:$0x3f] (!%p599_p7)   ;;  %vm888_vm1 = vcmask (!%p599_p7), 228352  }
  0x25   : > { %932 = vmatprep.subr.bf16.mxu0 (!%p599_p7), %v6646_v28  ;;  %2336 = vmatprep.subr.bf16.mxu1 (!%p599_p7), %v6646_v28  ;;  %v6651_v32 = vld [vmem:[%s8195_s1 + $0x30] ss:$8 sps:$4 sm:$0x3f] (!%p599_p7)   ;;  %s6618_s28 = smul.u32 (!%p599_p7), 224, %s605_s22  ;;  %v6655_v34 = vld [vmem:[%s8195_s1 + $0x4] ss:$8 sps:$4 sm:$0xff] (!%p599_p7)  }
  0x26   : > { %933 = vmatpush1.bf16.msra.mxu0 (!%p599_p7), %v6648_v29  ;;  %2337 = vmatpush1.bf16.msra.mxu1 (!%p599_p7), %v6648_v29  ;;  %v927_v33 = vsel (!%p599_p7), %vm925_vm0, %v6651_v32, 0  ;;  %v6653_v35 = vld [vmem:[%s8195_s1] ss:$8 sps:$4 sm:$0xff] (!%p599_p7)   ;;  %v6668_v38 = vld [vmem:[%s8195_s1 + $0x14] ss:$8 sps:$4 sm:$0x3f] (!%p599_p7)  }
  0x27   : > { %5563 = vmatprep.subr.msk.bf16.mxu0 (!%p599_p7), %vm925_vm0, %v6649_v31  ;;  %5704 = vmatprep.subr.msk.bf16.mxu1 (!%p599_p7), %vm925_vm0, %v6649_v31  ;;  %s7127_s13 = scalar_lea.vmem (!%p599_p7), [#allocation2], %s6618_s28  ;;  %v6671_v42 = vld [vmem:[%s8195_s1 + $0x10] ss:$8 sps:$4 sm:$0x3f] (!%p599_p7)   ;;  %v6685_v47 = vld [vmem:[%s8195_s1 + $0x44] ss:$8 sps:$4 sm:$0xff] (!%p599_p7)  }
  0x28   : > { %v7130_v36 = vld [vmem:[%s7127_s13 + $0x70] sm:$0xff] (!%p599_p7)   ;;  %v7133_v37 = vld [vmem:[%s7127_s13 + $0x8] sm:$0xff] (!%p599_p7)   ;;  %v7145_v39 = vld [vmem:[%s7127_s13 + $0x78] sm:$0xff] (!%p599_p7)   ;;  %v1200_v44 = vsel (!%p599_p7), %vm925_vm0, %v6671_v42, 0  ;;  %vm3629_vm2 = vcmask (!%p599_p7), 1043456   ;;  %vm3616_vm3 = vcmask (!%p599_p7), 588800  }
  0x29   : > { %v7150_v40 = vld [vmem:[%s7127_s13 + $0x10] sm:$0xff] (!%p599_p7)   ;;  %v7159_v41 = vld [vmem:[%s7127_s13 + $0x80] sm:$0xff] (!%p599_p7)   ;;  %v7165_v43 = vld [vmem:[%s7127_s13 + $0x18] sm:$0xff] (!%p599_p7)   ;;  %vm6946_vm4 = vmmov (!%p599_p7), 0   ;;  %vm4836_vm5 = vcmask (!%p599_p7), 523264   ;;  %vm5192_vm6 = vcmask (!%p599_p7), 982016  }
  0x2a   : > { %935 = vmatpush1.bf16.msra.mxu0 (!%p599_p7), %v927_v33  ;;  %2339 = vmatpush1.bf16.msra.mxu1 (!%p599_p7), %v927_v33  ;;  %v7175_v45 = vld [vmem:[%s7127_s13 + $0x88] sm:$0xff] (!%p599_p7)   ;;  %v7178_v46 = vld [vmem:[%s7127_s13 + $0x20] sm:$0xff] (!%p599_p7)   ;;  %v7190_v48 = vld [vmem:[%s7127_s13 + $0x90] sm:$0xff] (!%p599_p7)   ;;  %vm5304_vm7 = vcmask (!%p599_p7), 1041408   ;;  %vm5300_vm8 = vcmask (!%p599_p7), 687104   ;;  %s5421_s26 = sshll.u32 (!%p599_p7), %s5414_s20, 1 }
  0x2b   : > { %1205 = vmatprep.subr.bf16.mxu0 %v6655_v34  ;;  %2489 = vmatprep.subr.bf16.mxu1 %v6655_v34  ;;  %v7193_v49 = vld [vmem:[%s7127_s13 + $0x28] sm:$0xff]   ;;  %v7202_v50 = vld [vmem:[%s7127_s13 + $0x98] sm:$0xff]   ;;  %v7205_v51 = vld [vmem:[%s7127_s13 + $0x30] sm:$0xff]   ;;  %p646_p8 = scmp.lt.s32.totalorder %s5421_s26, 3  ;;  %vm5349_vm9 = vcmask 80896  }
  0x2c   : > { %v7214_v52 = vld [vmem:[%s7127_s13 + $0xa0] sm:$0xff]   ;;  %v7217_v53 = vld [vmem:[%s7127_s13 + $0x38] sm:$0xff]   ;;  %v7226_v54 = vld [vmem:[%s7127_s13 + $0xa8] sm:$0xff]  }
  0x2d   : > { %5564 = vmatmul.mubr.msk.bf16.vlgmr.msra.gmra.mrb[0].mxu0 %vm888_vm1, %v7130_v36  ;;  %5705 = vmatmul.mubr.msk.bf16.vlgmr.msra.gmra.mrb[0].mxu1 %vm888_vm1, %v7133_v37  ;;  %v7229_v55 = vld [vmem:[%s7127_s13 + $0x40] sm:$0xff]   ;;  %v7238_v56 = vld [vmem:[%s7127_s13 + $0xb0] sm:$0xff]   ;;  %v7241_v57 = vld [vmem:[%s7127_s13 + $0x48] sm:$0xff]   ;;  %s8210_s26 = smov (!%p646_p8, %s5421_s26), 3 }
  0x2e   : > { %1206 = vmatpush1.bf16.msra.mxu0 %v6653_v35  ;;  %2490 = vmatpush1.bf16.msra.mxu1 %v6653_v35  ;;  %v7250_v58 = vld [vmem:[%s7127_s13 + $0xb8] sm:$0xff]   ;;  %v7253_v59 = vld [vmem:[%s7127_s13 + $0x50] sm:$0xff]   ;;  %v7262_v60 = vld [vmem:[%s7127_s13 + $0xc0] sm:$0xff]   ;;  %s5422_s27 = sshll.u32 %s8210_s26, 3 }
  0x2f   : > { %974 = vmatprep.mubr.bf16.mxu0 %v6944_v30  ;;  %2378 = vmatprep.mubr.bf16.mxu1 %v6944_v30  ;;  %v7265_v61 = vld [vmem:[%s7127_s13 + $0x58] sm:$0xff]   ;;  %v7274_v62 = vld [vmem:[%s7127_s13 + $0xc8] sm:$0xff]   ;;  %v7277_v63 = vld [vmem:[%s7127_s13 + $0x60] sm:$0xff]   ;;  %s649_s12 = scalar_lea.vmem %s8205_s11, %s5422_s27 }
  0x30   : > { %5592 = vmatprep.subr.msk.bf16.mxu0 %vm925_vm0, %v6668_v38  ;;  %5717 = vmatprep.subr.msk.bf16.mxu1 %vm925_vm0, %v6668_v38  ;;  %v6682_v0 = vld [vmem:[%s7127_s13] sm:$0xff]   ;;  %v6694_v2 = vld [vmem:[%s8195_s1 + $0x50] ss:$8 sps:$4 sm:$0x3f]   ;;  %v6686_v6 = vld [vmem:[%s7127_s13 + $0x8] sm:$0xff]  }
  0x31   : > { %v6683_v1 = vld [vmem:[%s8195_s1 + $0x40] ss:$8 sps:$4 sm:$0xff]   ;;  %v6692_v3 = vld [vmem:[%s8195_s1 + $0x54] ss:$8 sps:$4 sm:$0x3f]   ;;  %v1478_v4 = vsel %vm925_vm0, %v6694_v2, 0 }
  0x32   : > { %1208 = vmatpush1.bf16.msra.mxu0 %v1200_v44  ;;  %2492 = vmatpush1.bf16.msra.mxu1 %v1200_v44  ;;  %v6702_v5 = vld [vmem:[%s8195_s1 + $0x64] ss:$8 sps:$4 sm:$0xff]   ;;  %v6687_v7 = vld [vmem:[%s7127_s13 + $0x10] sm:$0xff]   ;;  %v6688_v8 = vld [vmem:[%s7127_s13 + $0x18] sm:$0xff]  }
  0x33   : > { %1483 = vmatprep.subr.bf16.mxu0 %v6685_v47  ;;  %2642 = vmatprep.subr.bf16.mxu1 %v6685_v47  ;;  %v6689_v9 = vld [vmem:[%s7127_s13 + $0x20] sm:$0xff]   ;;  %v6690_v10 = vld [vmem:[%s7127_s13 + $0x28] sm:$0xff]   ;;  %v6691_v11 = vld [vmem:[%s7127_s13 + $0x30] sm:$0xff]  }
  0x34   : > { %v6695_v12 = vld [vmem:[%s7127_s13 + $0x38] sm:$0xff]   ;;  %v6696_v13 = vld [vmem:[%s7127_s13 + $0x40] sm:$0xff]   ;;  %v6697_v14 = vld [vmem:[%s7127_s13 + $0x48] sm:$0xff]  }
  0x35   : > { %5565 = vmatmul.mubr.msk.bf16.gmra.mrb[4].mxu0 %vm888_vm1, %v7145_v39  ;;  %5706 = vmatmul.mubr.msk.bf16.gmra.mrb[4].mxu1 %vm888_vm1, %v7150_v40  ;;  %v6698_v15 = vld [vmem:[%s7127_s13 + $0x50] sm:$0xff]   ;;  %v6699_v16 = vld [vmem:[%s7127_s13 + $0x58] sm:$0xff]   ;;  %v6700_v18 = vld [vmem:[%s8195_s1 + $0x60] ss:$8 sps:$4 sm:$0xff]  }
  0x36   : > { %984 = vmatprep.mubr.bf16.mxu0 %v6944_v30  ;;  %2388 = vmatprep.mubr.bf16.mxu1 %v6944_v30  ;;  %v7373_v17 = vld [vmem:[%s7127_s13 + $0x78] sm:$0xff]   ;;  %v6720_v22 = vld [vmem:[%s8195_s1 + $0x84] ss:$8 sps:$4 sm:$0xff]   ;;  %v7415_v25 = vld [vmem:[%s7127_s13 + $0x90] sm:$0xff]  }
  0x37   : > { %v6712_v19 = vld [vmem:[%s8195_s1 + $0x70] ss:$8 sps:$4 sm:$0x3f]   ;;  %v6709_v20 = vld [vmem:[%s8195_s1 + $0x74] ss:$8 sps:$4 sm:$0x3f]  }
  0x38   : > { %v1804_v21 = vsel %vm925_vm0, %v6712_v19, 0  ;;  %v7397_v23 = vld [vmem:[%s7127_s13 + $0x80] sm:$0xff]   ;;  %v7406_v24 = vld [vmem:[%s7127_s13 + $0x88] sm:$0xff]   ;;  %v7424_v26 = vld [vmem:[%s7127_s13 + $0x98] sm:$0xff]  }
  0x39   : > { %v7433_v27 = vld [vmem:[%s7127_s13 + $0xa0] sm:$0xff]   ;;  %v7442_v28 = vld [vmem:[%s7127_s13 + $0xa8] sm:$0xff]   ;;  %v7451_v29 = vld [vmem:[%s7127_s13 + $0xb0] sm:$0xff]  }
  0x3a   : > { %v7460_v31 = vld [vmem:[%s7127_s13 + $0xb8] sm:$0xff]   ;;  %v7469_v32 = vld [vmem:[%s7127_s13 + $0xc0] sm:$0xff]   ;;  %v7478_v33 = vld [vmem:[%s7127_s13 + $0xc8] sm:$0xff]  }
  0x3b   : > { %v7487_v34 = vld [vmem:[%s7127_s13 + $0xd0] sm:$0xff]   ;;  %v7535_v42 = vld [vmem:[%s7127_s13 + $0x28] sm:$0xff]   ;;  %v7553_v44 = vld [vmem:[%s7127_s13 + $0x38] sm:$0xff]  }
  0x3c   : > { %v7496_v35 = vld [vmem:[%s7127_s13 + $0x10] sm:$0xff]   ;;  %v6747_v2 = vld [vmem:[%s7127_s13 + $0xd8] sm:$0xff]  }
  0x3d   : > { %5566 = vmatmul.mubr.msk.bf16.gmra.mrb[8].mxu0 %vm888_vm1, %v7159_v41  ;;  %5707 = vmatmul.mubr.msk.bf16.gmra.mrb[8].mxu1 %vm888_vm1, %v7165_v43  ;;  %v6727_v38 = vld [vmem:[%s8195_s1 + $0x94] ss:$8 sps:$4 sm:$0x3f]  }
  0x3e   : > { %994 = vmatprep.mubr.bf16.mxu0 %v6944_v30  ;;  %2398 = vmatprep.mubr.bf16.mxu1 %v6944_v30  ;;  %v6750_v47 = vld [vmem:[%s8197_s3 + $0x4c] ss:$8 sps:$4 sm:$0xff]  }
  0x45   : > { %5567 = vmatmul.mubr.msk.bf16.gmra.mrb[12].mxu0 %vm888_vm1, %v7175_v45  ;;  %5708 = vmatmul.mubr.msk.bf16.gmra.mrb[12].mxu1 %vm888_vm1, %v7178_v46 }
  0x46   : > { %1004 = vmatprep.mubr.bf16.mxu0 %v6944_v30  ;;  %2408 = vmatprep.mubr.bf16.mxu1 %v6944_v30 }
  0x4d   : > { %5568 = vmatmul.mubr.msk.bf16.gmra.mrb[16].mxu0 %vm888_vm1, %v7190_v48  ;;  %5709 = vmatmul.mubr.msk.bf16.gmra.mrb[16].mxu1 %vm888_vm1, %v7193_v49 }
  0x4e   : > { %1014 = vmatprep.mubr.bf16.mxu0 %v6944_v30  ;;  %2418 = vmatprep.mubr.bf16.mxu1 %v6944_v30 }
  0x55   : > { %5569 = vmatmul.mubr.msk.bf16.gmra.mrb[20].mxu0 %vm888_vm1, %v7202_v50  ;;  %5710 = vmatmul.mubr.msk.bf16.gmra.mrb[20].mxu1 %vm888_vm1, %v7205_v51 }
  0x56   : > { %1024 = vmatprep.mubr.bf16.mxu0 %v6944_v30  ;;  %2428 = vmatprep.mubr.bf16.mxu1 %v6944_v30 }
  0x5d   : > { %5570 = vmatmul.mubr.msk.bf16.gmra.mrb[24].mxu0 %vm888_vm1, %v7214_v52  ;;  %5711 = vmatmul.mubr.msk.bf16.gmra.mrb[24].mxu1 %vm888_vm1, %v7217_v53 }
  0x5e   : > { %1034 = vmatprep.mubr.bf16.mxu0 %v6944_v30  ;;  %2438 = vmatprep.mubr.bf16.mxu1 %v6944_v30 }
  0x65   : > { %5571 = vmatmul.mubr.msk.bf16.gmra.mrb[28].mxu0 %vm888_vm1, %v7226_v54  ;;  %5712 = vmatmul.mubr.msk.bf16.gmra.mrb[28].mxu1 %vm888_vm1, %v7229_v55 }
  0x66   : > { %1044 = vmatprep.mubr.bf16.mxu0 %v6944_v30  ;;  %2448 = vmatprep.mubr.bf16.mxu1 %v6944_v30 }
  0x6d   : > { %5572 = vmatmul.mubr.msk.bf16.gmra.mrb[32].mxu0 %vm888_vm1, %v7238_v56  ;;  %5713 = vmatmul.mubr.msk.bf16.gmra.mrb[32].mxu1 %vm888_vm1, %v7241_v57 }
  0x6e   : > { %1054 = vmatprep.mubr.bf16.mxu0 %v6944_v30  ;;  %2458 = vmatprep.mubr.bf16.mxu1 %v6944_v30 }
  0x75   : > { %5573 = vmatmul.mubr.msk.bf16.gmra.mrb[36].mxu0 %vm888_vm1, %v7250_v58  ;;  %5714 = vmatmul.mubr.msk.bf16.gmra.mrb[36].mxu1 %vm888_vm1, %v7253_v59 }
  0x76   : > { %1064 = vmatprep.mubr.bf16.mxu0 %v6944_v30  ;;  %2468 = vmatprep.mubr.bf16.mxu1 %v6944_v30 }
  0x7d   : > { %5574 = vmatmul.mubr.msk.bf16.gmra.mrb[40].mxu0 %vm888_vm1, %v7262_v60  ;;  %5715 = vmatmul.mubr.msk.bf16.gmra.mrb[40].mxu1 %vm888_vm1, %v7265_v61 }
  0x7e   : > { %1074 = vmatprep.mubr.bf16.mxu0 %v6944_v30  ;;  %2478 = vmatprep.mubr.bf16.mxu1 %v6944_v30 }
  0x85   : > { %5575 = vmatmul.mubr.msk.bf16.gmra.mrb[44].mxu0 %vm888_vm1, %v7274_v62  ;;  %5716 = vmatmul.mubr.msk.bf16.gmra.mrb[44].mxu1 %vm888_vm1, %v7277_v63 }
  0x86   : > { %1237 = vmatprep.mubr.bf16.mxu0 %v6944_v30  ;;  %2521 = vmatprep.mubr.bf16.mxu1 %v6944_v30 }
  0x8d   : > { %5593 = vmatmul.mubr.msk.bf16.vlgmr.msra.gmra.mrb[0].mxu0 %vm888_vm1, %v6682_v0  ;;  %5718 = vmatmul.mubr.msk.bf16.vlgmr.msra.gmra.mrb[0].mxu1 %vm888_vm1, %v7130_v36  ;;  %v6718_v36 = vld [vmem:[%s8195_s1 + $0x80] ss:$8 sps:$4 sm:$0xff]  }
  0x8e   : > { %1484 = vmatpush1.bf16.msra.mxu0 %v6683_v1  ;;  %2643 = vmatpush1.bf16.msra.mxu1 %v6683_v1  ;;  %v6745_v0 = vld [vmem:[%s7127_s13 + $0xc8] sm:$0xff]   ;;  %v6746_v1 = vld [vmem:[%s7127_s13 + $0xd0] sm:$0xff]  }
  0x8f   : > { %1247 = vmatprep.mubr.bf16.mxu0 %v6944_v30  ;;  %2531 = vmatprep.mubr.bf16.mxu1 %v6944_v30 }
  0x90   : > { %5625 = vmatprep.subr.msk.bf16.mxu0 %vm925_vm0, %v6692_v3  ;;  %5730 = vmatprep.subr.msk.bf16.mxu1 %vm925_vm0, %v6692_v3  ;;  %v6756_v3 = vld [vmem:[%s8197_s3 + $0x6c] ss:$8 sps:$4 sm:$0xff]  }
  0x92   : > { %1486 = vmatpush1.bf16.msra.mxu0 %v1478_v4  ;;  %2645 = vmatpush1.bf16.msra.mxu1 %v1478_v4  ;;  %v6754_v4 = vld [vmem:[%s8197_s3 + $0x68] ss:$8 sps:$4 sm:$0xff]  }
  0x93   : > { %1809 = vmatprep.subr.bf16.mxu0 %v6702_v5  ;;  %2843 = vmatprep.subr.bf16.mxu1 %v6702_v5  ;;  %v6759_v5 = vld [vmem:[%s8197_s3 + $0x7c] ss:$8 sps:$4 sm:$0xff]  }
  0x95   : > { %5594 = vmatmul.mubr.msk.bf16.gmra.mrb[4].mxu0 %vm888_vm1, %v6686_v6  ;;  %5719 = vmatmul.mubr.msk.bf16.gmra.mrb[4].mxu1 %vm888_vm1, %v7145_v39  ;;  %v6757_v6 = vld [vmem:[%s8197_s3 + $0x78] ss:$8 sps:$4 sm:$0xff]  }
  0x96   : > { %1257 = vmatprep.mubr.bf16.mxu0 %v6944_v30  ;;  %2541 = vmatprep.mubr.bf16.mxu1 %v6944_v30 }
  0x9d   : > { %5595 = vmatmul.mubr.msk.bf16.gmra.mrb[8].mxu0 %vm888_vm1, %v6687_v7  ;;  %5720 = vmatmul.mubr.msk.bf16.gmra.mrb[8].mxu1 %vm888_vm1, %v7159_v41  ;;  %v7526_v41 = vld [vmem:[%s7127_s13 + $0x20] sm:$0xff]   ;;  %v5790_v7 = vld [vmem:[%s8197_s3 + $0x88] sm:$0xff] }
  0x9e   : > { %1267 = vmatprep.mubr.bf16.mxu0 %v6944_v30  ;;  %2551 = vmatprep.mubr.bf16.mxu1 %v6944_v30 }
  0xa5   : > { %5596 = vmatmul.mubr.msk.bf16.gmra.mrb[12].mxu0 %vm888_vm1, %v6688_v8  ;;  %5721 = vmatmul.mubr.msk.bf16.gmra.mrb[12].mxu1 %vm888_vm1, %v7175_v45  ;;  %v7562_v45 = vld [vmem:[%s7127_s13 + $0x40] sm:$0xff]   ;;  %v5800_v8 = vcombine.high %v5790_v7, %v5790_v7 }
  0xa6   : > { %1277 = vmatprep.mubr.bf16.mxu0 %v6944_v30  ;;  %2561 = vmatprep.mubr.bf16.mxu1 %v6944_v30 }
  0xad   : > { %5597 = vmatmul.mubr.msk.bf16.gmra.mrb[16].mxu0 %vm888_vm1, %v6689_v9  ;;  %5722 = vmatmul.mubr.msk.bf16.gmra.mrb[16].mxu1 %vm888_vm1, %v7190_v48  ;;  %v7583_v48 = vld [vmem:[%s7127_s13 + $0x50] sm:$0xff]   ;;  %v5799_v9 = vcombine.low %v5790_v7, %v5790_v7 }
  0xae   : > { %1287 = vmatprep.mubr.bf16.mxu0 %v6944_v30  ;;  %2571 = vmatprep.mubr.bf16.mxu1 %v6944_v30 }
  0xb5   : > { %5598 = vmatmul.mubr.msk.bf16.gmra.mrb[20].mxu0 %vm888_vm1, %v6690_v10  ;;  %5723 = vmatmul.mubr.msk.bf16.gmra.mrb[20].mxu1 %vm888_vm1, %v7202_v50  ;;  %v7601_v50 = vld [vmem:[%s7127_s13 + $0x60] sm:$0xff]   ;;  %v3631_v10 = vsel %vm3629_vm2, %v5799_v9, 0 }
  0xb6   : > { %1297 = vmatprep.mubr.bf16.mxu0 %v6944_v30  ;;  %2581 = vmatprep.mubr.bf16.mxu1 %v6944_v30 }
  0xbd   : > { %5599 = vmatmul.mubr.msk.bf16.gmra.mrb[24].mxu0 %vm888_vm1, %v6691_v11  ;;  %5724 = vmatmul.mubr.msk.bf16.gmra.mrb[24].mxu1 %vm888_vm1, %v7214_v52  ;;  %v6736_v52 = vld [vmem:[%s7127_s13 + $0x80] sm:$0xff]  }
  0xbe   : > { %1307 = vmatprep.mubr.bf16.mxu0 %v6944_v30  ;;  %2591 = vmatprep.mubr.bf16.mxu1 %v6944_v30  ;;  %v6764_v11 = vld [vmem:[%s8197_s3 + $0x4] ss:$8 sps:$4 sm:$0xff]  }
  0xc5   : > { %5600 = vmatmul.mubr.msk.bf16.gmra.mrb[28].mxu0 %vm888_vm1, %v6695_v12  ;;  %5725 = vmatmul.mubr.msk.bf16.gmra.mrb[28].mxu1 %vm888_vm1, %v7226_v54  ;;  %v6753_v54 = vld [vmem:[%s8197_s3 + $0x5c] ss:$8 sps:$4 sm:$0xff]  }
  0xc6   : > { %1317 = vmatprep.mubr.bf16.mxu0 %v6944_v30  ;;  %2601 = vmatprep.mubr.bf16.mxu1 %v6944_v30 }
  0xcd   : > { %5601 = vmatmul.mubr.msk.bf16.gmra.mrb[32].mxu0 %vm888_vm1, %v6696_v13  ;;  %5726 = vmatmul.mubr.msk.bf16.gmra.mrb[32].mxu1 %vm888_vm1, %v7238_v56  ;;  %v6737_v56 = vld [vmem:[%s7127_s13 + $0x88] sm:$0xff]  }
  0xce   : > { %1327 = vmatprep.mubr.bf16.mxu0 %v6944_v30  ;;  %2611 = vmatprep.mubr.bf16.mxu1 %v6944_v30 }
  0xd5   : > { %5602 = vmatmul.mubr.msk.bf16.gmra.mrb[36].mxu0 %vm888_vm1, %v6697_v14  ;;  %5727 = vmatmul.mubr.msk.bf16.gmra.mrb[36].mxu1 %vm888_vm1, %v7250_v58  ;;  %v6739_v58 = vld [vmem:[%s7127_s13 + $0x98] sm:$0xff]  }
  0xd6   : > { %1337 = vmatprep.mubr.bf16.mxu0 %v6944_v30  ;;  %2621 = vmatprep.mubr.bf16.mxu1 %v6944_v30 }
  0xdd   : > { %5603 = vmatmul.mubr.msk.bf16.gmra.mrb[40].mxu0 %vm888_vm1, %v6698_v15  ;;  %5728 = vmatmul.mubr.msk.bf16.gmra.mrb[40].mxu1 %vm888_vm1, %v7262_v60  ;;  %v6741_v60 = vld [vmem:[%s7127_s13 + $0xa8] sm:$0xff]  }
  0xde   : > { %1347 = vmatprep.mubr.bf16.mxu0 %v6944_v30  ;;  %2631 = vmatprep.mubr.bf16.mxu1 %v6944_v30 }
  0xe5   : > { %5604 = vmatmul.mubr.msk.bf16.gmra.mrb[44].mxu0 %vm888_vm1, %v6699_v16  ;;  %5729 = vmatmul.mubr.msk.bf16.gmra.mrb[44].mxu1 %vm888_vm1, %v7274_v62  ;;  %v6743_v62 = vld [vmem:[%s7127_s13 + $0xb8] sm:$0xff]  }
  0xe6   : > { %1515 = vmatprep.mubr.bf16.mxu0 %v6944_v30  ;;  %2674 = vmatprep.mubr.bf16.mxu1 %v6944_v30 }
  0xed   : > { %5626 = vmatmul.mubr.msk.bf16.vlgmr.msra.gmra.mrb[0].mxu0 %vm888_vm1, %v7133_v37  ;;  %5731 = vmatmul.mubr.msk.bf16.vlgmr.msra.gmra.mrb[0].mxu1 %vm888_vm1, %v7373_v17  ;;  %v6730_v37 = vld [vmem:[%s8195_s1 + $0x90] ss:$8 sps:$4 sm:$0x3f]  }
  0xee   : > { %1810 = vmatpush1.bf16.msra.mxu0 %v6700_v18  ;;  %2844 = vmatpush1.bf16.msra.mxu1 %v6700_v18  ;;  %v2130_v39 = vsel %vm925_vm0, %v6730_v37, 0 }
  0xef   : > { %1525 = vmatprep.mubr.bf16.mxu0 %v6944_v30  ;;  %2684 = vmatprep.mubr.bf16.mxu1 %v6944_v30 }
  0xf0   : > { %5658 = vmatprep.subr.msk.bf16.mxu0 %vm925_vm0, %v6709_v20  ;;  %5743 = vmatprep.subr.msk.bf16.mxu1 %vm925_vm0, %v6709_v20  ;;  %v7723_v20 = vld [vmem:[%s8196_s2] ss:$0 sm:$0xff] }
  0xf2   : > { %1812 = vmatpush1.bf16.msra.mxu0 %v1804_v21  ;;  %2846 = vmatpush1.bf16.msra.mxu1 %v1804_v21 }
  0xf3   : > { %2135 = vmatprep.subr.bf16.mxu0 %v6720_v22  ;;  %3140 = vmatprep.subr.bf16.mxu1 %v6720_v22 }
  0xf5   : > { %5627 = vmatmul.mubr.msk.bf16.gmra.mrb[4].mxu0 %vm888_vm1, %v7150_v40  ;;  %5732 = vmatmul.mubr.msk.bf16.gmra.mrb[4].mxu1 %vm888_vm1, %v7397_v23  ;;  %v7517_v40 = vld [vmem:[%s7127_s13 + $0x18] sm:$0xff]  }
  0xf6   : > { %1535 = vmatprep.mubr.bf16.mxu0 %v6944_v30  ;;  %2694 = vmatprep.mubr.bf16.mxu1 %v6944_v30 }
  0xfd   : > { %5628 = vmatmul.mubr.msk.bf16.gmra.mrb[8].mxu0 %vm888_vm1, %v7165_v43  ;;  %5733 = vmatmul.mubr.msk.bf16.gmra.mrb[8].mxu1 %vm888_vm1, %v7406_v24  ;;  %v7544_v43 = vld [vmem:[%s7127_s13 + $0x30] sm:$0xff]  }
  0xfe   : > { %1545 = vmatprep.mubr.bf16.mxu0 %v6944_v30  ;;  %2704 = vmatprep.mubr.bf16.mxu1 %v6944_v30 }
 0x105   : > { %5629 = vmatmul.mubr.msk.bf16.gmra.mrb[12].mxu0 %vm888_vm1, %v7178_v46  ;;  %5734 = vmatmul.mubr.msk.bf16.gmra.mrb[12].mxu1 %vm888_vm1, %v7415_v25  ;;  %v7571_v46 = vld [vmem:[%s7127_s13 + $0x48] sm:$0xff]  }
 0x106   : > { %1555 = vmatprep.mubr.bf16.mxu0 %v6944_v30  ;;  %2714 = vmatprep.mubr.bf16.mxu1 %v6944_v30 }
 0x10d   : > { %5630 = vmatmul.mubr.msk.bf16.gmra.mrb[16].mxu0 %vm888_vm1, %v7193_v49  ;;  %5735 = vmatmul.mubr.msk.bf16.gmra.mrb[16].mxu1 %vm888_vm1, %v7424_v26  ;;  %v7592_v49 = vld [vmem:[%s7127_s13 + $0x58] sm:$0xff]  }
 0x10e   : > { %1565 = vmatprep.mubr.bf16.mxu0 %v6944_v30  ;;  %2724 = vmatprep.mubr.bf16.mxu1 %v6944_v30 }
 0x115   : > { %5631 = vmatmul.mubr.msk.bf16.gmra.mrb[20].mxu0 %vm888_vm1, %v7205_v51  ;;  %5736 = vmatmul.mubr.msk.bf16.gmra.mrb[20].mxu1 %vm888_vm1, %v7433_v27  ;;  %v7610_v51 = vld [vmem:[%s7127_s13 + $0x68] sm:$0xff]  }
 0x116   : > { %1575 = vmatprep.mubr.bf16.mxu0 %v6944_v30  ;;  %2734 = vmatprep.mubr.bf16.mxu1 %v6944_v30 }
 0x11d   : > { %5632 = vmatmul.mubr.msk.bf16.gmra.mrb[24].mxu0 %vm888_vm1, %v7217_v53  ;;  %5737 = vmatmul.mubr.msk.bf16.gmra.mrb[24].mxu1 %vm888_vm1, %v7442_v28  ;;  %v6748_v53 = vld [vmem:[%s8197_s3 + $0x48] ss:$8 sps:$4 sm:$0xff]  }
 0x11e   : > { %1585 = vmatprep.mubr.bf16.mxu0 %v6944_v30  ;;  %2744 = vmatprep.mubr.bf16.mxu1 %v6944_v30 }
 0x125   : > { %5633 = vmatmul.mubr.msk.bf16.gmra.mrb[28].mxu0 %vm888_vm1, %v7229_v55  ;;  %5738 = vmatmul.mubr.msk.bf16.gmra.mrb[28].mxu1 %vm888_vm1, %v7451_v29  ;;  %v6751_v55 = vld [vmem:[%s8197_s3 + $0x58] ss:$8 sps:$4 sm:$0xff]  }
 0x126   : > { %1595 = vmatprep.mubr.bf16.mxu0 %v6944_v30  ;;  %2754 = vmatprep.mubr.bf16.mxu1 %v6944_v30 }
 0x12d   : > { %5634 = vmatmul.mubr.msk.bf16.gmra.mrb[32].mxu0 %vm888_vm1, %v7241_v57  ;;  %5739 = vmatmul.mubr.msk.bf16.gmra.mrb[32].mxu1 %vm888_vm1, %v7460_v31  ;;  %v6738_v57 = vld [vmem:[%s7127_s13 + $0x90] sm:$0xff]  }
 0x12e   : > { %1605 = vmatprep.mubr.bf16.mxu0 %v6944_v30  ;;  %2764 = vmatprep.mubr.bf16.mxu1 %v6944_v30 }
 0x135   : > { %5635 = vmatmul.mubr.msk.bf16.gmra.mrb[36].mxu0 %vm888_vm1, %v7253_v59  ;;  %5740 = vmatmul.mubr.msk.bf16.gmra.mrb[36].mxu1 %vm888_vm1, %v7469_v32  ;;  %v6740_v59 = vld [vmem:[%s7127_s13 + $0xa0] sm:$0xff]  }
 0x136   : > { %1615 = vmatprep.mubr.bf16.mxu0 %v6944_v30  ;;  %2774 = vmatprep.mubr.bf16.mxu1 %v6944_v30 }
 0x13d   : > { %5636 = vmatmul.mubr.msk.bf16.gmra.mrb[40].mxu0 %vm888_vm1, %v7265_v61  ;;  %5741 = vmatmul.mubr.msk.bf16.gmra.mrb[40].mxu1 %vm888_vm1, %v7478_v33  ;;  %v6742_v61 = vld [vmem:[%s7127_s13 + $0xb0] sm:$0xff]  }
 0x13e   : > { %1625 = vmatprep.mubr.bf16.mxu0 %v6944_v30  ;;  %2784 = vmatprep.mubr.bf16.mxu1 %v6944_v30 }
 0x145   : > { %5637 = vmatmul.mubr.msk.bf16.gmra.mrb[44].mxu0 %vm888_vm1, %v7277_v63  ;;  %5742 = vmatmul.mubr.msk.bf16.gmra.mrb[44].mxu1 %vm888_vm1, %v7487_v34  ;;  %v6744_v63 = vld [vmem:[%s7127_s13 + $0xc0] sm:$0xff]  }
 0x146   : > { %1841 = vmatprep.mubr.bf16.mxu0 %v6944_v30  ;;  %2875 = vmatprep.mubr.bf16.mxu1 %v6944_v30 }
 0x14d   : > { %5659 = vmatmul.mubr.msk.bf16.vlgmr.msra.gmra.mrb[0].mxu0 %vm888_vm1, %v7373_v17  ;;  %5744 = vmatmul.mubr.msk.bf16.vlgmr.msra.gmra.mrb[0].mxu1 %vm888_vm1, %v7496_v35 }
 0x14e   : > { %2136 = vmatpush1.bf16.msra.mxu0 %v6718_v36  ;;  %3141 = vmatpush1.bf16.msra.mxu1 %v6718_v36 }
 0x14f   : > { %1851 = vmatprep.mubr.bf16.mxu0 %v6944_v30  ;;  %2885 = vmatprep.mubr.bf16.mxu1 %v6944_v30 }
 0x150   : > { %5691 = vmatprep.subr.msk.bf16.mxu0 %vm925_vm0, %v6727_v38  ;;  %5768 = vmatprep.subr.msk.bf16.mxu1 %vm925_vm0, %v6727_v38 }
 0x152   : > { %2138 = vmatpush1.bf16.msra.mxu0 %v2130_v39  ;;  %3143 = vmatpush1.bf16.msra.mxu1 %v2130_v39 }
 0x153   : > { %3636 = vmatprep.subr.bf16.mxu0 %v6750_v47  ;;  %4304 = vmatprep.subr.bf16.mxu1 %v6750_v47 }
 0x155   : > { %5660 = vmatmul.mubr.msk.bf16.gmra.mrb[4].mxu0 %vm888_vm1, %v7397_v23  ;;  %5745 = vmatmul.mubr.msk.bf16.gmra.mrb[4].mxu1 %vm888_vm1, %v7517_v40 }
 0x156   : > { %1861 = vmatprep.mubr.bf16.mxu0 %v6944_v30  ;;  %2895 = vmatprep.mubr.bf16.mxu1 %v6944_v30 }
 0x15d   : > { %5661 = vmatmul.mubr.msk.bf16.gmra.mrb[8].mxu0 %vm888_vm1, %v7406_v24  ;;  %5746 = vmatmul.mubr.msk.bf16.gmra.mrb[8].mxu1 %vm888_vm1, %v7526_v41 }
 0x15e   : > { %1871 = vmatprep.mubr.bf16.mxu0 %v6944_v30  ;;  %2905 = vmatprep.mubr.bf16.mxu1 %v6944_v30 }
 0x165   : > { %5662 = vmatmul.mubr.msk.bf16.gmra.mrb[12].mxu0 %vm888_vm1, %v7415_v25  ;;  %5747 = vmatmul.mubr.msk.bf16.gmra.mrb[12].mxu1 %vm888_vm1, %v7535_v42 }
 0x166   : > { %1881 = vmatprep.mubr.bf16.mxu0 %v6944_v30  ;;  %2915 = vmatprep.mubr.bf16.mxu1 %v6944_v30 }
 0x16d   : > { %5663 = vmatmul.mubr.msk.bf16.gmra.mrb[16].mxu0 %vm888_vm1, %v7424_v26  ;;  %5748 = vmatmul.mubr.msk.bf16.gmra.mrb[16].mxu1 %vm888_vm1, %v7544_v43 }
 0x16e   : > { %1891 = vmatprep.mubr.bf16.mxu0 %v6944_v30  ;;  %2925 = vmatprep.mubr.bf16.mxu1 %v6944_v30 }
 0x175   : > { %5664 = vmatmul.mubr.msk.bf16.gmra.mrb[20].mxu0 %vm888_vm1, %v7433_v27  ;;  %5749 = vmatmul.mubr.msk.bf16.gmra.mrb[20].mxu1 %vm888_vm1, %v7553_v44 }
 0x176   : > { %1901 = vmatprep.mubr.bf16.mxu0 %v6944_v30  ;;  %2935 = vmatprep.mubr.bf16.mxu1 %v6944_v30 }
 0x17d   : > { %5665 = vmatmul.mubr.msk.bf16.gmra.mrb[24].mxu0 %vm888_vm1, %v7442_v28  ;;  %5750 = vmatmul.mubr.msk.bf16.gmra.mrb[24].mxu1 %vm888_vm1, %v7562_v45 }
 0x17e   : > { %1911 = vmatprep.mubr.bf16.mxu0 %v6944_v30  ;;  %2945 = vmatprep.mubr.bf16.mxu1 %v6944_v30 }
 0x185   : > { %5666 = vmatmul.mubr.msk.bf16.gmra.mrb[28].mxu0 %vm888_vm1, %v7451_v29  ;;  %5751 = vmatmul.mubr.msk.bf16.gmra.mrb[28].mxu1 %vm888_vm1, %v7571_v46 }
 0x186   : > { %1921 = vmatprep.mubr.bf16.mxu0 %v6944_v30  ;;  %2955 = vmatprep.mubr.bf16.mxu1 %v6944_v30 }
 0x18d   : > { %5667 = vmatmul.mubr.msk.bf16.gmra.mrb[32].mxu0 %vm888_vm1, %v7460_v31  ;;  %5752 = vmatmul.mubr.msk.bf16.gmra.mrb[32].mxu1 %vm888_vm1, %v7583_v48 }
 0x18e   : > { %1931 = vmatprep.mubr.bf16.mxu0 %v6944_v30  ;;  %2965 = vmatprep.mubr.bf16.mxu1 %v6944_v30 }
 0x195   : > { %5668 = vmatmul.mubr.msk.bf16.gmra.mrb[36].mxu0 %vm888_vm1, %v7469_v32  ;;  %5753 = vmatmul.mubr.msk.bf16.gmra.mrb[36].mxu1 %vm888_vm1, %v7592_v49 }
 0x196   : > { %1941 = vmatprep.mubr.bf16.mxu0 %v6944_v30  ;;  %2975 = vmatprep.mubr.bf16.mxu1 %v6944_v30 }
 0x19d   : > { %5669 = vmatmul.mubr.msk.bf16.gmra.mrb[40].mxu0 %vm888_vm1, %v7478_v33  ;;  %5754 = vmatmul.mubr.msk.bf16.gmra.mrb[40].mxu1 %vm888_vm1, %v7601_v50 }
 0x19e   : > { %1951 = vmatprep.mubr.bf16.mxu0 %v6944_v30  ;;  %2985 = vmatprep.mubr.bf16.mxu1 %v6944_v30 }
 0x1a5   : > { %5670 = vmatmul.mubr.msk.bf16.gmra.mrb[44].mxu0 %vm888_vm1, %v7487_v34  ;;  %5755 = vmatmul.mubr.msk.bf16.gmra.mrb[44].mxu1 %vm888_vm1, %v7610_v51 }
 0x1a6   : > { %2167 = vmatprep.mubr.bf16.mxu0 %v6944_v30  ;;  %3172 = vmatprep.mubr.bf16.mxu1 %v6944_v30 }
 0x1ad   : > { %5692 = vmatmul.mubr.msk.bf16.vlgmr.msra.gmra.mrb[0].mxu0 %vm888_vm1, %v7496_v35  ;;  %5769 = vmatmul.mubr.msk.bf16.vlgmr.msra.gmra.mrb[0].mxu1 %vm888_vm1, %v6736_v52 }
 0x1ae   : > { %2177 = vmatprep.mubr.bf16.mxu0 %v6944_v30  ;;  %3182 = vmatprep.mubr.bf16.mxu1 %v6944_v30 }
 0x1af   : > { %3637 = vmatpush1.bf16.msra.mxu0 %v6748_v53  ;;  %4305 = vmatpush1.bf16.msra.mxu1 %v6748_v53 }
 0x1b0   : > { %3638 = vmatprep.subr.bf16.mxu0 %v6753_v54  ;;  %4306 = vmatprep.subr.bf16.mxu1 %v6753_v54 }
 0x1b3   : > { %3639 = vmatpush1.bf16.msra.mxu0 %v6751_v55  ;;  %4307 = vmatpush1.bf16.msra.mxu1 %v6751_v55 }
 0x1b4   : > { %3640 = vmatprep.subr.bf16.mxu0 %v6756_v3  ;;  %4308 = vmatprep.subr.bf16.mxu1 %v6756_v3 }
 0x1b5   : > { %5693 = vmatmul.mubr.msk.bf16.gmra.mrb[4].mxu0 %vm888_vm1, %v7517_v40  ;;  %5770 = vmatmul.mubr.msk.bf16.gmra.mrb[4].mxu1 %vm888_vm1, %v6737_v56 }
 0x1b6   : > { %2187 = vmatprep.mubr.bf16.mxu0 %v6944_v30  ;;  %3192 = vmatprep.mubr.bf16.mxu1 %v6944_v30 }
 0x1b7   : > { %3641 = vmatpush1.bf16.msra.mxu0 %v6754_v4  ;;  %4309 = vmatpush1.bf16.msra.mxu1 %v6754_v4 }
 0x1b8   : > { %3642 = vmatprep.subr.bf16.mxu0 %v6759_v5  ;;  %4310 = vmatprep.subr.bf16.mxu1 %v6759_v5 }
 0x1bb   : > { %3643 = vmatpush1.bf16.msra.mxu0 %v6757_v6  ;;  %4311 = vmatpush1.bf16.msra.mxu1 %v6757_v6 }
 0x1bc   : > { %5801 = vmatprep.subr.msk.bf16.mxu0 %vm3629_vm2, %v5800_v8  ;;  %5893 = vmatprep.subr.msk.bf16.mxu1 %vm3629_vm2, %v5800_v8 }
 0x1bd   : > { %5694 = vmatmul.mubr.msk.bf16.gmra.mrb[8].mxu0 %vm888_vm1, %v7526_v41  ;;  %5771 = vmatmul.mubr.msk.bf16.gmra.mrb[8].mxu1 %vm888_vm1, %v6738_v57 }
 0x1be   : > { %2197 = vmatprep.mubr.bf16.mxu0 %v6944_v30  ;;  %3202 = vmatprep.mubr.bf16.mxu1 %v6944_v30 }
 0x1bf   : > { %3645 = vmatpush1.bf16.msra.mxu0 %v3631_v10  ;;  %4313 = vmatpush1.bf16.msra.mxu1 %v3631_v10 }
 0x1c0   : > { %3772 = vmatprep.subr.bf16.mxu0 %v6764_v11  ;;  %4377 = vmatprep.subr.bf16.mxu1 %v6764_v11 }
 0x1c5   : > { %5695 = vmatmul.mubr.msk.bf16.gmra.mrb[12].mxu0 %vm888_vm1, %v7535_v42  ;;  %5772 = vmatmul.mubr.msk.bf16.gmra.mrb[12].mxu1 %vm888_vm1, %v6739_v58 }
 0x1c6   : > { %2207 = vmatprep.mubr.bf16.mxu0 %v6944_v30  ;;  %3212 = vmatprep.mubr.bf16.mxu1 %v6944_v30 }
 0x1cd   : > { %5696 = vmatmul.mubr.msk.bf16.gmra.mrb[16].mxu0 %vm888_vm1, %v7544_v43  ;;  %5773 = vmatmul.mubr.msk.bf16.gmra.mrb[16].mxu1 %vm888_vm1, %v6740_v59 }
 0x1ce   : > { %2217 = vmatprep.mubr.bf16.mxu0 %v6944_v30  ;;  %3222 = vmatprep.mubr.bf16.mxu1 %v6944_v30 }
 0x1d5   : > { %5697 = vmatmul.mubr.msk.bf16.gmra.mrb[20].mxu0 %vm888_vm1, %v7553_v44  ;;  %5774 = vmatmul.mubr.msk.bf16.gmra.mrb[20].mxu1 %vm888_vm1, %v6741_v60 }
 0x1d6   : > { %2227 = vmatprep.mubr.bf16.mxu0 %v6944_v30  ;;  %3232 = vmatprep.mubr.bf16.mxu1 %v6944_v30 }
 0x1dd   : > { %5698 = vmatmul.mubr.msk.bf16.gmra.mrb[24].mxu0 %vm888_vm1, %v7562_v45  ;;  %5775 = vmatmul.mubr.msk.bf16.gmra.mrb[24].mxu1 %vm888_vm1, %v6742_v61 }
 0x1de   : > { %2237 = vmatprep.mubr.bf16.mxu0 %v6944_v30  ;;  %3242 = vmatprep.mubr.bf16.mxu1 %v6944_v30 }
 0x1e5   : > { %5699 = vmatmul.mubr.msk.bf16.gmra.mrb[28].mxu0 %vm888_vm1, %v7571_v46  ;;  %5776 = vmatmul.mubr.msk.bf16.gmra.mrb[28].mxu1 %vm888_vm1, %v6743_v62 }
 0x1e6   : > { %2247 = vmatprep.mubr.bf16.mxu0 %v6944_v30  ;;  %3252 = vmatprep.mubr.bf16.mxu1 %v6944_v30 }
 0x1ed   : > { %5700 = vmatmul.mubr.msk.bf16.gmra.mrb[32].mxu0 %vm888_vm1, %v7583_v48  ;;  %5777 = vmatmul.mubr.msk.bf16.gmra.mrb[32].mxu1 %vm888_vm1, %v6744_v63 }
 0x1ee   : > { %2257 = vmatprep.mubr.bf16.mxu0 %v6944_v30  ;;  %3262 = vmatprep.mubr.bf16.mxu1 %v6944_v30 }
 0x1f5   : > { %5701 = vmatmul.mubr.msk.bf16.gmra.mrb[36].mxu0 %vm888_vm1, %v7592_v49  ;;  %5778 = vmatmul.mubr.msk.bf16.gmra.mrb[36].mxu1 %vm888_vm1, %v6745_v0 }
 0x1f6   : > { %2267 = vmatprep.mubr.bf16.mxu0 %v6944_v30  ;;  %3272 = vmatprep.mubr.bf16.mxu1 %v6944_v30 }
 0x1fd   : > { %5702 = vmatmul.mubr.msk.bf16.gmra.mrb[40].mxu0 %vm888_vm1, %v7601_v50  ;;  %5779 = vmatmul.mubr.msk.bf16.gmra.mrb[40].mxu1 %vm888_vm1, %v6746_v1 }
 0x1fe   : > { %2277 = vmatprep.mubr.bf16.mxu0 %v6944_v30  ;;  %3282 = vmatprep.mubr.bf16.mxu1 %v6944_v30 }
 0x205   : > { %5703 = vmatmul.mubr.msk.bf16.gmra.mrb[44].mxu0 %vm888_vm1, %v7610_v51  ;;  %5780 = vmatmul.mubr.msk.bf16.gmra.mrb[44].mxu1 %vm888_vm1, %v6747_v2 }
 0x206   : > { %3668 = vmatprep.mubr.bf16.mxu0 %v6944_v30  ;;  %4336 = vmatprep.mubr.bf16.mxu1 %v6944_v30 }
 0x280   : > { %v2169_v12 = vpop.f32.mrb[0].mxu0  ;;  %v3174_v13 = vpop.f32.mrb[0].mxu1 }
 0x281   : > { %v3341_v14 = vmax.f32 %v2169_v12, %v3174_v13  ;;  %v2171_v15 = vpop.f32.mrb[1].mxu0  ;;  %v3176_v16 = vpop.f32.mrb[1].mxu1 }
 0x282   : > { %v3342_v17 = vmax.f32 %v2171_v15, %v3176_v16  ;;  %v2173_v18 = vpop.f32.mrb[2].mxu0  ;;  %v3178_v19 = vpop.f32.mrb[2].mxu1 }
 0x283   : > { %v3343_v21 = vmax.f32 %v2173_v18, %v3178_v19  ;;  %v2175_v22 = vpop.f32.mrb[3].mxu0  ;;  %v3180_v23 = vpop.f32.mrb[3].mxu1 }
 0x284   : > { %v3389_v24 = vmax.f32 %v3341_v14, %v3342_v17  ;;  %v3344_v25 = vmax.f32 %v2175_v22, %v3180_v23 }
 0x286   : > { %v3420_v26 = vadd.f32 %v7723_v20, %v3389_v24  ;;  %v3390_v27 = vmax.f32 %v3343_v21, %v3344_v25 }
 0x288   : > { %v3444_v28 = vmul.f32 0.5, %v3420_v26  ;;  %v3421_v29 = vadd.f32 %v7723_v20, %v3390_v27  ;;  %v2179_v31 = vpop.f32.mrb[4].mxu0  ;;  %v3184_v32 = vpop.f32.mrb[4].mxu1 }
 0x289   : > { %v3345_v33 = vmax.f32 %v2179_v31, %v3184_v32  ;;  %v2181_v34 = vpop.f32.mrb[5].mxu0  ;;  %v3186_v35 = vpop.f32.mrb[5].mxu1 }
 0x28a   : > { %6848 = vtanh.f32 %v3444_v28  ;;  %v3445_v36 = vmul.f32 0.5, %v3421_v29  ;;  %v3346_v37 = vmax.f32 %v2181_v34, %v3186_v35  ;;  %v2183_v38 = vpop.f32.mrb[6].mxu0  ;;  %v3188_v39 = vpop.f32.mrb[6].mxu1 }
 0x28b   : > { %v3347_v40 = vmax.f32 %v2183_v38, %v3188_v39  ;;  %v2185_v41 = vpop.f32.mrb[7].mxu0  ;;  %v3190_v42 = vpop.f32.mrb[7].mxu1 }
 0x28c   : > { %6850 = vtanh.f32 %v3445_v36  ;;  %v3391_v43 = vmax.f32 %v3345_v33, %v3346_v37  ;;  %v3348_v44 = vmax.f32 %v2185_v41, %v3190_v42 }
 0x28e   : > { %v3422_v45 = vadd.f32 %v7723_v20, %v3391_v43  ;;  %v3392_v46 = vmax.f32 %v3347_v40, %v3348_v44 }
 0x290   : > { %v3446_v47 = vmul.f32 0.5, %v3422_v45  ;;  %v3423_v48 = vadd.f32 %v7723_v20, %v3392_v46  ;;  %v2189_v49 = vpop.f32.mrb[8].mxu0  ;;  %v3194_v50 = vpop.f32.mrb[8].mxu1  ;;  %v6762_v45 = vld [vmem:[%s8197_s3] ss:$8 sps:$4 sm:$0xff]  }
 0x291   : > { %v3349_v51 = vmax.f32 %v2189_v49, %v3194_v50  ;;  %v2191_v52 = vpop.f32.mrb[9].mxu0  ;;  %v3196_v53 = vpop.f32.mrb[9].mxu1  ;;  %v6767_v50 = vld [vmem:[%s8197_s3 + $0x14] ss:$8 sps:$4 sm:$0xff]  }
 0x292   : > { %6852 = vtanh.f32 %v3446_v47  ;;  %v3447_v54 = vmul.f32 0.5, %v3423_v48  ;;  %v3350_v55 = vmax.f32 %v2191_v52, %v3196_v53  ;;  %v2193_v56 = vpop.f32.mrb[10].mxu0  ;;  %v3198_v57 = vpop.f32.mrb[10].mxu1 }
 0x293   : > { %v3351_v58 = vmax.f32 %v2193_v56, %v3198_v57  ;;  %v2195_v59 = vpop.f32.mrb[11].mxu0  ;;  %v3200_v60 = vpop.f32.mrb[11].mxu1 }
 0x294   : > { %v6849_v61 = vpop.eup %6848  ;;  %6854 = vtanh.f32 %v3447_v54  ;;  %v3393_v62 = vmax.f32 %v3349_v51, %v3350_v55  ;;  %v3352_v63 = vmax.f32 %v2195_v59, %v3200_v60  ;;  %v6770_v60 = vld [vmem:[%s8197_s3 + $0x24] ss:$8 sps:$4 sm:$0xff]  }
 0x295   : > { %v3492_v0 = vmul.f32 0.5, %v6849_v61 }
 0x296   : > { %v6851_v1 = vpop.eup %6850  ;;  %v3424_v2 = vadd.f32 %v7723_v20, %v3393_v62  ;;  %v3394_v3 = vmax.f32 %v3351_v58, %v3352_v63  ;;  %v6765_v58 = vld [vmem:[%s8197_s3 + $0x10] ss:$8 sps:$4 sm:$0xff]  }
 0x297   : > { %v3493_v4 = vmul.f32 0.5, %v6851_v1  ;;  %v7731_v9 = vadd.f32 0.5, %v3492_v0 }
 0x298   : > { %v3448_v5 = vmul.f32 0.5, %v3424_v2  ;;  %v3425_v6 = vadd.f32 %v7723_v20, %v3394_v3  ;;  %v2199_v7 = vpop.f32.mrb[12].mxu0  ;;  %v3204_v8 = vpop.f32.mrb[12].mxu1 }
 0x299   : > { %v7733_v10 = vadd.f32 0.5, %v3493_v4  ;;  %v3353_v11 = vmax.f32 %v2199_v7, %v3204_v8  ;;  %v2201_v12 = vpop.f32.mrb[13].mxu0  ;;  %v3206_v13 = vpop.f32.mrb[13].mxu1 }
 0x29a   : > { %6856 = vtanh.f32 %v3448_v5  ;;  %v3449_v14 = vmul.f32 0.5, %v3425_v6  ;;  %v3354_v15 = vmax.f32 %v2201_v12, %v3206_v13  ;;  %v2203_v16 = vpop.f32.mrb[14].mxu0  ;;  %v3208_v17 = vpop.f32.mrb[14].mxu1 }
 0x29b   : > { %v3540_v18 = vpack.c.bf16 %v7733_v10, %v7731_v9  ;;  %v3355_v19 = vmax.f32 %v2203_v16, %v3208_v17  ;;  %v2205_v21 = vpop.f32.mrb[15].mxu0  ;;  %v3210_v22 = vpop.f32.mrb[15].mxu1  ;;  %v6768_v16 = vld [vmem:[%s8197_s3 + $0x20] ss:$8 sps:$4 sm:$0xff]  }
 0x29c   : > { %v6853_v23 = vpop.eup %6852  ;;  %6858 = vtanh.f32 %v3449_v14  ;;  %v3395_v24 = vmax.f32 %v3353_v11, %v3354_v15  ;;  %v3356_v25 = vmax.f32 %v2205_v21, %v3210_v22  ;;  %v6773_v22 = vld [vmem:[%s8197_s3 + $0x34] ss:$8 sps:$4 sm:$0xff]  }
 0x29d   : > { %v3494_v26 = vmul.f32 0.5, %v6853_v23 }
 0x29e   : > { %v6855_v27 = vpop.eup %6854  ;;  %v3426_v28 = vadd.f32 %v7723_v20, %v3395_v24  ;;  %v3396_v29 = vmax.f32 %v3355_v19, %v3356_v25  ;;  %v3560_v24 = vld [vmem:[%s8197_s3 + $0x40] sm:$0xff] }
 0x29f   : > { %v3495_v31 = vmul.f32 0.5, %v6855_v27  ;;  %v3518_v36 = vadd.f32 0.5, %v3494_v26 }
 0x2a0   : > { %v3450_v32 = vmul.f32 0.5, %v3426_v28  ;;  %v3427_v33 = vadd.f32 %v7723_v20, %v3396_v29  ;;  %v2209_v34 = vpop.f32.mrb[16].mxu0  ;;  %v3214_v35 = vpop.f32.mrb[16].mxu1  ;;  %v6771_v29 = vld [vmem:[%s8197_s3 + $0x30] ss:$8 sps:$4 sm:$0xff]  }
 0x2a1   : > { %v3519_v37 = vadd.f32 0.5, %v3495_v31  ;;  %v3357_v38 = vmax.f32 %v2209_v34, %v3214_v35  ;;  %v2211_v39 = vpop.f32.mrb[17].mxu0  ;;  %v3216_v40 = vpop.f32.mrb[17].mxu1  ;;  %v5815_v35 = vcombine.high %v3560_v24, %v3560_v24 }
 0x2a2   : > { %6860 = vtanh.f32 %v3450_v32  ;;  %v3451_v41 = vmul.f32 0.5, %v3427_v33  ;;  %v3358_v42 = vmax.f32 %v2211_v39, %v3216_v40  ;;  %v2213_v43 = vpop.f32.mrb[18].mxu0  ;;  %v3218_v44 = vpop.f32.mrb[18].mxu1 }
 0x2a3   : > { %v7742_v46 = vpack.c.bf16 %v3519_v37, %v3518_v36  ;;  %v3359_v47 = vmax.f32 %v2213_v43, %v3218_v44  ;;  %v2215_v48 = vpop.f32.mrb[19].mxu0  ;;  %v3220_v49 = vpop.f32.mrb[19].mxu1  ;;  %v5814_v36 = vcombine.low %v3560_v24, %v3560_v24 }
 0x2a4   : > { %v6857_v51 = vpop.eup %6856  ;;  %6862 = vtanh.f32 %v3451_v41  ;;  %v3397_v52 = vmax.f32 %v3357_v38, %v3358_v42  ;;  %v3360_v53 = vmax.f32 %v2215_v48, %v3220_v49 }
 0x2a5   : > { %v3496_v54 = vmul.f32 0.5, %v6857_v51  ;;  %5802 = vmatmul.mubr.msk.bf16.vlgmr.msra.gmra.mrb[48].mxu0 %vm3616_vm3, %v7742_v46 }
 0x2a6   : > { %v6859_v55 = vpop.eup %6858  ;;  %v3428_v56 = vadd.f32 %v7723_v20, %v3397_v52  ;;  %v3398_v57 = vmax.f32 %v3359_v47, %v3360_v53  ;;  %3678 = vmatprep.mubr.bf16.mxu0 %v6944_v30  ;;  %3773 = vmatpush1.bf16.msra.mxu0 %v6762_v45 }
 0x2a7   : > { %v3497_v59 = vmul.f32 0.5, %v6859_v55  ;;  %3774 = vmatprep.subr.bf16.mxu0 %v6767_v50  ;;  %v3520_v1 = vadd.f32 0.5, %v3496_v54  ;;  %v3767_v54 = vsel %vm3629_vm2, %v5814_v36, 0  ;;  %v6778_v55 = vld [vmem:[%s8197_s3 + $0x94] ss:$8 sps:$4 sm:$0xff]  }
 0x2a8   : > { %v3452_v61 = vmul.f32 0.5, %v3428_v56  ;;  %v3429_v62 = vadd.f32 %v7723_v20, %v3398_v57  ;;  %v2219_v63 = vpop.f32.mrb[20].mxu0  ;;  %v3224_v0 = vpop.f32.mrb[20].mxu1 }
 0x2a9   : > { %v3521_v2 = vadd.f32 0.5, %v3497_v59  ;;  %v3361_v3 = vmax.f32 %v2219_v63, %v3224_v0  ;;  %v2221_v4 = vpop.f32.mrb[21].mxu0  ;;  %v3226_v5 = vpop.f32.mrb[21].mxu1 }
 0x2aa   : > { %6864 = vtanh.f32 %v3452_v61  ;;  %v3453_v6 = vmul.f32 0.5, %v3429_v62  ;;  %v3362_v7 = vmax.f32 %v2221_v4, %v3226_v5  ;;  %v2223_v8 = vpop.f32.mrb[22].mxu0  ;;  %v3228_v11 = vpop.f32.mrb[22].mxu1  ;;  %3775 = vmatpush1.bf16.msra.mxu0 %v6765_v58 }
 0x2ab   : > { %v7758_v12 = vpack.c.bf16 %v3521_v2, %v3520_v1  ;;  %v3363_v13 = vmax.f32 %v2223_v8, %v3228_v11  ;;  %v2225_v14 = vpop.f32.mrb[23].mxu0  ;;  %v3230_v15 = vpop.f32.mrb[23].mxu1  ;;  %3776 = vmatprep.subr.bf16.mxu0 %v6770_v60 }
 0x2ac   : > { %v6861_v17 = vpop.eup %6860  ;;  %6866 = vtanh.f32 %v3453_v6  ;;  %v3399_v19 = vmax.f32 %v3361_v3, %v3362_v7  ;;  %v3364_v21 = vmax.f32 %v2225_v14, %v3230_v15 }
 0x2ad   : > { %v3498_v23 = vmul.f32 0.5, %v6861_v17  ;;  %5894 = vmatmul.mubr.msk.bf16.vlgmr.msra.gmra.mrb[48].mxu1 %vm3616_vm3, %v7758_v12 }
 0x2ae   : > { %v6863_v25 = vpop.eup %6862  ;;  %v3430_v26 = vadd.f32 %v7723_v20, %v3399_v19  ;;  %v3400_v27 = vmax.f32 %v3363_v13, %v3364_v21  ;;  %4346 = vmatprep.mubr.bf16.mxu1 %v6944_v30  ;;  %4378 = vmatpush1.bf16.msra.mxu1 %v6762_v45 }
 0x2af   : > { %v3499_v28 = vmul.f32 0.5, %v6863_v25  ;;  %4379 = vmatprep.subr.bf16.mxu1 %v6767_v50  ;;  %3777 = vmatpush1.bf16.msra.mxu0 %v6768_v16  ;;  %v3522_v37 = vadd.f32 0.5, %v3498_v23 }
 0x2b0   : > { %v3454_v31 = vmul.f32 0.5, %v3430_v26  ;;  %v3431_v32 = vadd.f32 %v7723_v20, %v3400_v27  ;;  %v2229_v33 = vpop.f32.mrb[24].mxu0  ;;  %v3234_v34 = vpop.f32.mrb[24].mxu1  ;;  %3778 = vmatprep.subr.bf16.mxu0 %v6773_v22 }
 0x2b1   : > { %v3523_v38 = vadd.f32 0.5, %v3499_v28  ;;  %v3365_v39 = vmax.f32 %v2229_v33, %v3234_v34  ;;  %v2231_v40 = vpop.f32.mrb[25].mxu0  ;;  %v3236_v41 = vpop.f32.mrb[25].mxu1 }
 0x2b2   : > { %6868 = vtanh.f32 %v3454_v31  ;;  %v3455_v42 = vmul.f32 0.5, %v3431_v32  ;;  %v3366_v43 = vmax.f32 %v2231_v40, %v3236_v41  ;;  %v2233_v44 = vpop.f32.mrb[26].mxu0  ;;  %v3238_v45 = vpop.f32.mrb[26].mxu1  ;;  %4380 = vmatpush1.bf16.msra.mxu1 %v6765_v58 }
 0x2b3   : > { %v3367_v47 = vmax.f32 %v2233_v44, %v3238_v45  ;;  %v2235_v48 = vpop.f32.mrb[27].mxu0  ;;  %v3240_v49 = vpop.f32.mrb[27].mxu1  ;;  %v7777_v50 = vpack.c.bf16 %v3523_v38, %v3522_v37  ;;  %4381 = vmatprep.subr.bf16.mxu1 %v6770_v60  ;;  %3779 = vmatpush1.bf16.msra.mxu0 %v6771_v29 }
 0x2b4   : > { %v6865_v51 = vpop.eup %6864  ;;  %6870 = vtanh.f32 %v3455_v42  ;;  %v3401_v52 = vmax.f32 %v3365_v39, %v3366_v43  ;;  %v3368_v53 = vmax.f32 %v2235_v48, %v3240_v49  ;;  %5816 = vmatprep.subr.msk.bf16.mxu0 %vm3629_vm2, %v5815_v35 }
 0x2b5   : > { %v3500_v56 = vmul.f32 0.5, %v6865_v51  ;;  %5803 = vmatmul.mubr.msk.bf16.gmra.mrb[52].mxu0 %vm3616_vm3, %v7777_v50 }
 0x2b6   : > { %v6867_v57 = vpop.eup %6866  ;;  %v3432_v58 = vadd.f32 %v7723_v20, %v3401_v52  ;;  %v3402_v59 = vmax.f32 %v3367_v47, %v3368_v53  ;;  %3688 = vmatprep.mubr.bf16.mxu0 %v6944_v30  ;;  %4382 = vmatpush1.bf16.msra.mxu1 %v6768_v16 }
 0x2b7   : > { %v3501_v60 = vmul.f32 0.5, %v6867_v57  ;;  %4383 = vmatprep.subr.bf16.mxu1 %v6773_v22  ;;  %3781 = vmatpush1.bf16.msra.mxu0 %v3767_v54  ;;  %v3524_v1 = vadd.f32 0.5, %v3500_v56 }
 0x2b8   : > { %v3456_v61 = vmul.f32 0.5, %v3432_v58  ;;  %v3433_v62 = vadd.f32 %v7723_v20, %v3402_v59  ;;  %v2239_v63 = vpop.f32.mrb[28].mxu0  ;;  %v3244_v0 = vpop.f32.mrb[28].mxu1  ;;  %3909 = vmatprep.subr.bf16.mxu0 %v6778_v55 }
 0x2b9   : > { %v3525_v2 = vadd.f32 0.5, %v3501_v60  ;;  %v3369_v3 = vmax.f32 %v2239_v63, %v3244_v0  ;;  %v2241_v4 = vpop.f32.mrb[29].mxu0  ;;  %v3246_v5 = vpop.f32.mrb[29].mxu1 }
 0x2ba   : > { %6872 = vtanh.f32 %v3456_v61  ;;  %v3457_v6 = vmul.f32 0.5, %v3433_v62  ;;  %v3370_v7 = vmax.f32 %v2241_v4, %v3246_v5  ;;  %v2243_v8 = vpop.f32.mrb[30].mxu0  ;;  %v3248_v11 = vpop.f32.mrb[30].mxu1  ;;  %4384 = vmatpush1.bf16.msra.mxu1 %v6771_v29 }
 0x2bb   : > { %v7789_v13 = vpack.c.bf16 %v3525_v2, %v3524_v1  ;;  %v3371_v14 = vmax.f32 %v2243_v8, %v3248_v11  ;;  %v2245_v15 = vpop.f32.mrb[31].mxu0  ;;  %v3250_v16 = vpop.f32.mrb[31].mxu1  ;;  %5898 = vmatprep.subr.msk.bf16.mxu1 %vm3629_vm2, %v5815_v35 }
 0x2bc   : > { %v6869_v17 = vpop.eup %6868  ;;  %6874 = vtanh.f32 %v3457_v6  ;;  %v3403_v19 = vmax.f32 %v3369_v3, %v3370_v7  ;;  %v3372_v21 = vmax.f32 %v2245_v15, %v3250_v16 }
 0x2bd   : > { %v3502_v22 = vmul.f32 0.5, %v6869_v17  ;;  %5895 = vmatmul.mubr.msk.bf16.gmra.mrb[52].mxu1 %vm3616_vm3, %v7789_v13 }
 0x2be   : > { %v6871_v23 = vpop.eup %6870  ;;  %v3434_v24 = vadd.f32 %v7723_v20, %v3403_v19  ;;  %v3404_v25 = vmax.f32 %v3371_v14, %v3372_v21  ;;  %4356 = vmatprep.mubr.bf16.mxu1 %v6944_v30  ;;  %4386 = vmatpush1.bf16.msra.mxu1 %v3767_v54 }
 0x2bf   : > { %v3503_v26 = vmul.f32 0.5, %v6871_v23  ;;  %4450 = vmatprep.subr.bf16.mxu1 %v6778_v55  ;;  %v3526_v32 = vadd.f32 0.5, %v3502_v22 }
 0x2c0   : > { %v3458_v27 = vmul.f32 0.5, %v3434_v24  ;;  %v3435_v28 = vadd.f32 %v7723_v20, %v3404_v25  ;;  %v2249_v29 = vpop.f32.mrb[32].mxu0  ;;  %v3254_v31 = vpop.f32.mrb[32].mxu1 }
 0x2c1   : > { %v3527_v33 = vadd.f32 0.5, %v3503_v26  ;;  %v3373_v34 = vmax.f32 %v2249_v29, %v3254_v31  ;;  %v2251_v35 = vpop.f32.mrb[33].mxu0  ;;  %v3256_v36 = vpop.f32.mrb[33].mxu1 }
 0x2c2   : > { %6876 = vtanh.f32 %v3458_v27  ;;  %v3459_v37 = vmul.f32 0.5, %v3435_v28  ;;  %v3374_v38 = vmax.f32 %v2251_v35, %v3256_v36  ;;  %v2253_v39 = vpop.f32.mrb[34].mxu0  ;;  %v3258_v40 = vpop.f32.mrb[34].mxu1 }
 0x2c3   : > { %v7797_v41 = vpack.c.bf16 %v3527_v33, %v3526_v32  ;;  %v3375_v42 = vmax.f32 %v2253_v39, %v3258_v40  ;;  %v2255_v43 = vpop.f32.mrb[35].mxu0  ;;  %v3260_v44 = vpop.f32.mrb[35].mxu1 }
 0x2c4   : > { %v6873_v45 = vpop.eup %6872  ;;  %6878 = vtanh.f32 %v3459_v37  ;;  %v3405_v47 = vmax.f32 %v3373_v34, %v3374_v38  ;;  %v3376_v48 = vmax.f32 %v2255_v43, %v3260_v44 }
 0x2c5   : > { %v3504_v49 = vmul.f32 0.5, %v6873_v45  ;;  %5804 = vmatmul.mubr.msk.bf16.gmra.mrb[56].mxu0 %vm3616_vm3, %v7797_v41 }
 0x2c6   : > { %v6875_v51 = vpop.eup %6874  ;;  %v3436_v52 = vadd.f32 %v7723_v20, %v3405_v47  ;;  %v3406_v53 = vmax.f32 %v3375_v42, %v3376_v48  ;;  %3698 = vmatprep.mubr.bf16.mxu0 %v6944_v30 }
 0x2c7   : > { %v3505_v54 = vmul.f32 0.5, %v6875_v51  ;;  %v3528_v59 = vadd.f32 0.5, %v3504_v49 }
 0x2c8   : > { %v3460_v55 = vmul.f32 0.5, %v3436_v52  ;;  %v3437_v56 = vadd.f32 %v7723_v20, %v3406_v53  ;;  %v2259_v57 = vpop.f32.mrb[36].mxu0  ;;  %v3264_v58 = vpop.f32.mrb[36].mxu1 }
 0x2c9   : > { %v3529_v60 = vadd.f32 0.5, %v3505_v54  ;;  %v3377_v61 = vmax.f32 %v2259_v57, %v3264_v58  ;;  %v2261_v62 = vpop.f32.mrb[37].mxu0  ;;  %v3266_v63 = vpop.f32.mrb[37].mxu1 }
 0x2ca   : > { %6880 = vtanh.f32 %v3460_v55  ;;  %v3461_v0 = vmul.f32 0.5, %v3437_v56  ;;  %v3378_v1 = vmax.f32 %v2261_v62, %v3266_v63  ;;  %v2263_v2 = vpop.f32.mrb[38].mxu0  ;;  %v3268_v3 = vpop.f32.mrb[38].mxu1 }
 0x2cb   : > { %v7804_v4 = vpack.c.bf16 %v3529_v60, %v3528_v59  ;;  %v3379_v5 = vmax.f32 %v2263_v2, %v3268_v3  ;;  %v2265_v6 = vpop.f32.mrb[39].mxu0  ;;  %v3270_v7 = vpop.f32.mrb[39].mxu1 }
 0x2cc   : > { %v6877_v8 = vpop.eup %6876  ;;  %6882 = vtanh.f32 %v3461_v0  ;;  %v3407_v11 = vmax.f32 %v3377_v61, %v3378_v1  ;;  %v3380_v14 = vmax.f32 %v2265_v6, %v3270_v7 }
 0x2cd   : > { %v3506_v15 = vmul.f32 0.5, %v6877_v8  ;;  %5896 = vmatmul.mubr.msk.bf16.gmra.mrb[56].mxu1 %vm3616_vm3, %v7804_v4 }
 0x2ce   : > { %v6879_v16 = vpop.eup %6878  ;;  %v3438_v17 = vadd.f32 %v7723_v20, %v3407_v11  ;;  %v3408_v19 = vmax.f32 %v3379_v5, %v3380_v14  ;;  %4366 = vmatprep.mubr.bf16.mxu1 %v6944_v30  ;;  %v6776_v5 = vld [vmem:[%s8197_s3 + $0x90] ss:$8 sps:$4 sm:$0xff]   ;;  %v6781_v11 = vld [vmem:[%s8197_s3 + $0xa4] ss:$8 sps:$4 sm:$0xff]  }
 0x2cf   : > { %v3507_v21 = vmul.f32 0.5, %v6879_v16  ;;  %v3530_v26 = vadd.f32 0.5, %v3506_v15 }
 0x2d0   : > { %v3462_v22 = vmul.f32 0.5, %v3438_v17  ;;  %v3439_v23 = vadd.f32 %v7723_v20, %v3408_v19  ;;  %v2269_v24 = vpop.f32.mrb[40].mxu0  ;;  %v3274_v25 = vpop.f32.mrb[40].mxu1 }
 0x2d1   : > { %v3531_v27 = vadd.f32 0.5, %v3507_v21  ;;  %v3381_v28 = vmax.f32 %v2269_v24, %v3274_v25  ;;  %v2271_v29 = vpop.f32.mrb[41].mxu0  ;;  %v3276_v31 = vpop.f32.mrb[41].mxu1  ;;  %v6779_v21 = vld [vmem:[%s8197_s3 + $0xa0] ss:$8 sps:$4 sm:$0xff]  }
 0x2d2   : > { %6884 = vtanh.f32 %v3462_v22  ;;  %v3463_v32 = vmul.f32 0.5, %v3439_v23  ;;  %v3382_v33 = vmax.f32 %v2271_v29, %v3276_v31  ;;  %v2273_v34 = vpop.f32.mrb[42].mxu0  ;;  %v3278_v35 = vpop.f32.mrb[42].mxu1  ;;  %v5829_v31 = vld [vmem:[%s8197_s3 + $0xd0] sm:$0xff] }
 0x2d3   : > { %v7811_v36 = vpack.c.bf16 %v3531_v27, %v3530_v26  ;;  %v3383_v37 = vmax.f32 %v2273_v34, %v3278_v35  ;;  %v2275_v38 = vpop.f32.mrb[43].mxu0  ;;  %v3280_v39 = vpop.f32.mrb[43].mxu1  ;;  %v6782_v27 = vld [vmem:[%s8197_s3 + $0xb0] ss:$8 sps:$4 sm:$0xff]   ;;  %v5838_v35 = vcombine.low %v5829_v31, %v5829_v31 }
 0x2d4   : > { %v6881_v40 = vpop.eup %6880  ;;  %6886 = vtanh.f32 %v3463_v32  ;;  %v3409_v42 = vmax.f32 %v3381_v28, %v3382_v33  ;;  %v3384_v43 = vmax.f32 %v2275_v38, %v3280_v39  ;;  %v6787_v28 = vld [vmem:[%s8197_s3 + $0xc4] ss:$8 sps:$4 sm:$0xff]  }
 0x2d5   : > { %v3508_v44 = vmul.f32 0.5, %v6881_v40  ;;  %5805 = vmatmul.mubr.msk.bf16.gmra.mrb[60].mxu0 %vm3616_vm3, %v7811_v36 }
 0x2d6   : > { %v6883_v45 = vpop.eup %6882  ;;  %v3440_v47 = vadd.f32 %v7723_v20, %v3409_v42  ;;  %v3410_v48 = vmax.f32 %v3383_v37, %v3384_v43  ;;  %3804 = vmatprep.mubr.bf16.mxu0 %v6944_v30  ;;  %v5839_v37 = vcombine.high %v5829_v31, %v5829_v31  ;;  %v3904_v42 = vsel %vm3629_vm2, %v5838_v35, 0  ;;  %v6792_v43 = vld [vmem:[%s8197_s3 + $0xdc] ss:$8 sps:$4 sm:$0xff]  }
 0x2d7   : > { %v3509_v49 = vmul.f32 0.5, %v6883_v45  ;;  %v3532_v55 = vadd.f32 0.5, %v3508_v44 }
 0x2d8   : > { %v3464_v51 = vmul.f32 0.5, %v3440_v47  ;;  %v3441_v52 = vadd.f32 %v7723_v20, %v3410_v48  ;;  %v2279_v53 = vpop.f32.mrb[44].mxu0  ;;  %v3284_v54 = vpop.f32.mrb[44].mxu1 }
 0x2d9   : > { %v3533_v56 = vadd.f32 0.5, %v3509_v49  ;;  %v3385_v57 = vmax.f32 %v2279_v53, %v3284_v54  ;;  %v2281_v58 = vpop.f32.mrb[45].mxu0  ;;  %v3286_v59 = vpop.f32.mrb[45].mxu1  ;;  %v6793_v53 = vld [vmem:[%s8197_s3 + $0xe8] ss:$8 sps:$4 sm:$0xff]  }
 0x2da   : > { %6888 = vtanh.f32 %v3464_v51  ;;  %v3465_v60 = vmul.f32 0.5, %v3441_v52  ;;  %v3386_v61 = vmax.f32 %v2281_v58, %v3286_v59  ;;  %v2283_v62 = vpop.f32.mrb[46].mxu0  ;;  %v3288_v63 = vpop.f32.mrb[46].mxu1  ;;  %v6790_v51 = vld [vmem:[%s8197_s3 + $0xd8] ss:$8 sps:$4 sm:$0xff]  }
 0x2db   : > { %v3387_v0 = vmax.f32 %v2283_v62, %v3288_v63  ;;  %v2285_v1 = vpop.f32.mrb[47].mxu0  ;;  %v3290_v2 = vpop.f32.mrb[47].mxu1  ;;  %v7818_v3 = vpack.c.bf16 %v3533_v56, %v3532_v55  ;;  %v6795_v52 = vld [vmem:[%s8197_s3 + $0xec] ss:$8 sps:$4 sm:$0xff]   ;;  %v6798_v54 = vld [vmem:[%s8197_s3 + $0xfc] ss:$8 sps:$4 sm:$0xff]  }
 0x2dc   : > { %v6885_v6 = vpop.eup %6884  ;;  %6890 = vtanh.f32 %v3465_v60  ;;  %v3411_v7 = vmax.f32 %v3385_v57, %v3386_v61  ;;  %v3388_v8 = vmax.f32 %v2285_v1, %v3290_v2  ;;  %v6801_v55 = vld [vmem:[%s8197_s3 + $0x10c] ss:$8 sps:$4 sm:$0xff]   ;;  %v5853_v56 = vld [vmem:[%s8197_s3 + $0x118] sm:$0xff]  ;;  %v6799_v57 = vld [vmem:[%s8197_s3 + $0x108] ss:$8 sps:$4 sm:$0xff]  }
 0x2dd   : > { %v3510_v14 = vmul.f32 0.5, %v6885_v6  ;;  %5817 = vmatmul.mubr.msk.bf16.vlgmr.msra.gmra.mrb[48].mxu0 %vm3616_vm3, %v3540_v18  ;;  %5897 = vmatmul.mubr.msk.bf16.gmra.mrb[60].mxu1 %vm3616_vm3, %v7818_v3  ;;  %v6784_v18 = vld [vmem:[%s8197_s3 + $0xb4] ss:$8 sps:$4 sm:$0xff]   ;;  %v5862_v58 = vcombine.low %v5853_v56, %v5853_v56  ;;  %v5863_v59 = vcombine.high %v5853_v56, %v5853_v56  ;;  %v6806_v61 = vld [vmem:[%s8197_s3 + $0x124] ss:$8 sps:$4 sm:$0xff]  }
 0x2de   : > { %v6887_v15 = vpop.eup %6886  ;;  %v3442_v16 = vadd.f32 %v7723_v20, %v3411_v7  ;;  %v3412_v17 = vmax.f32 %v3387_v0, %v3388_v8  ;;  %3814 = vmatprep.mubr.bf16.mxu0 %v6944_v30  ;;  %4409 = vmatprep.mubr.bf16.mxu1 %v6944_v30  ;;  %v6804_v62 = vld [vmem:[%s8197_s3 + $0x120] ss:$8 sps:$4 sm:$0xff]   ;;  %v6809_v63 = vld [vmem:[%s8197_s3 + $0x134] ss:$8 sps:$4 sm:$0xff]   ;;  %v6807_v0 = vld [vmem:[%s8197_s3 + $0x130] ss:$8 sps:$4 sm:$0xff]  }
 0x2df   : > { %v3511_v19 = vmul.f32 0.5, %v6887_v15  ;;  %3910 = vmatpush1.bf16.msra.mxu0 %v6776_v5  ;;  %v3534_v22 = vadd.f32 0.5, %v3510_v14  ;;  %v4057_v60 = vsel %vm3629_vm2, %v5862_v58, 0  ;;  %v6812_v1 = vld [vmem:[%s8197_s3 + $0x144] ss:$8 sps:$4 sm:$0xff]   ;;  %v6824_v14 = vld [vmem:[%s8199_s5 + $0x18] sm:$0xff]  }
 0x2e0   : > { %v3466_v9 = vmul.f32 0.5, %v3442_v16  ;;  %v3443_v10 = vadd.f32 %v7723_v20, %v3412_v17  ;;  %3911 = vmatprep.subr.bf16.mxu0 %v6781_v11  ;;  %v6815_v2 = vld [vmem:[%s8197_s3 + $0x154] ss:$8 sps:$4 sm:$0xff]   ;;  %v6813_v6 = vld [vmem:[%s8197_s3 + $0x150] ss:$8 sps:$4 sm:$0xff]  }
 0x2e1   : > { %v3535_v23 = vadd.f32 0.5, %v3511_v19  ;;  %v6822_v15 = vld [vmem:[%s8199_s5 + $0x30] sm:$0xff]   ;;  %v6825_v16 = vld [vmem:[%s8199_s5 + $0x38] sm:$0xff]  }
 0x2e2   : > { %6892 = vtanh.f32 %v3466_v9  ;;  %v3467_v24 = vmul.f32 0.5, %v3443_v10 }
 0x2e3   : > { %3912 = vmatpush1.bf16.msra.mxu0 %v6779_v21  ;;  %v7842_v25 = vpack.c.bf16 %v3535_v23, %v3534_v22 }
 0x2e4   : > { %v6889_v26 = vpop.eup %6888  ;;  %6894 = vtanh.f32 %v3467_v24  ;;  %3913 = vmatprep.subr.bf16.mxu0 %v6784_v18 }
 0x2e5   : > { %v3512_v20 = vmul.f32 0.5, %v6889_v26  ;;  %5818 = vmatmul.mubr.msk.bf16.gmra.mrb[52].mxu0 %vm3616_vm3, %v7758_v12  ;;  %5899 = vmatmul.mubr.msk.bf16.vlgmr.msra.gmra.mrb[48].mxu1 %vm3616_vm3, %v7742_v46  ;;  %v6785_v46 = vld [vmem:[%s8197_s3 + $0xc0] ss:$8 sps:$4 sm:$0xff]  }
 0x2e6   : > { %v6891_v29 = vpop.eup %6890  ;;  %4451 = vmatpush1.bf16.msra.mxu1 %v6776_v5  ;;  %3824 = vmatprep.mubr.bf16.mxu0 %v6944_v30  ;;  %v5877_v5 = vld [vmem:[%s8197_s3 + $0x160] sm:$0xff] }
 0x2e7   : > { %v3513_v32 = vmul.f32 0.5, %v6891_v29  ;;  %4419 = vmatprep.mubr.bf16.mxu1 %v6944_v30  ;;  %4452 = vmatprep.subr.bf16.mxu1 %v6781_v11  ;;  %v3536_v33 = vadd.f32 0.5, %v3512_v20  ;;  %v5886_v7 = vcombine.low %v5877_v5, %v5877_v5  ;;  %v5887_v8 = vcombine.high %v5877_v5, %v5877_v5  ;;  %v8061_v20 = vld [vmem:[%s8198_s4] ss:$0 sm:$0xff] }
 0x2e8   : > { %3914 = vmatpush1.bf16.msra.mxu0 %v6782_v27 }
 0x2e9   : > { %v3537_v34 = vadd.f32 0.5, %v3513_v32  ;;  %3915 = vmatprep.subr.bf16.mxu0 %v6787_v28  ;;  %v4210_v11 = vsel %vm3629_vm2, %v5886_v7, 0 }
 0x2ea   : > { %4453 = vmatpush1.bf16.msra.mxu1 %v6779_v21 }
 0x2eb   : > { %4454 = vmatprep.subr.bf16.mxu1 %v6784_v18  ;;  %v7862_v38 = vpack.c.bf16 %v3537_v34, %v3536_v33 }
 0x2ec   : > { %v6893_v39 = vpop.eup %6892  ;;  %3916 = vmatpush1.bf16.msra.mxu0 %v6785_v46 }
 0x2ed   : > { %v3514_v40 = vmul.f32 0.5, %v6893_v39  ;;  %5819 = vmatmul.mubr.msk.bf16.gmra.mrb[56].mxu0 %vm3616_vm3, %v7789_v13  ;;  %5900 = vmatmul.mubr.msk.bf16.gmra.mrb[52].mxu1 %vm3616_vm3, %v7777_v50 }
 0x2ee   : > { %v6895_v44 = vpop.eup %6894  ;;  %4455 = vmatpush1.bf16.msra.mxu1 %v6782_v27  ;;  %3834 = vmatprep.mubr.bf16.mxu0 %v6944_v30 }
 0x2ef   : > { %v3515_v45 = vmul.f32 0.5, %v6895_v44  ;;  %4429 = vmatprep.mubr.bf16.mxu1 %v6944_v30  ;;  %5840 = vmatprep.subr.msk.bf16.mxu0 %vm3629_vm2, %v5839_v37  ;;  %v7875_v47 = vadd.f32 0.5, %v3514_v40 }
 0x2f0   : > { %4456 = vmatprep.subr.bf16.mxu1 %v6787_v28  ;;  %3918 = vmatpush1.bf16.msra.mxu0 %v3904_v42 }
 0x2f1   : > { %v7877_v48 = vadd.f32 0.5, %v3515_v45  ;;  %4062 = vmatprep.subr.bf16.mxu0 %v6792_v43 }
 0x2f2   : > { %4457 = vmatpush1.bf16.msra.mxu1 %v6785_v46 }
 0x2f3   : > { %5903 = vmatprep.subr.msk.bf16.mxu1 %vm3629_vm2, %v5839_v37  ;;  %v3551_v49 = vpack.c.bf16 %v7877_v48, %v7875_v47 }
 0x2f5   : > { %5820 = vmatmul.mubr.msk.bf16.gmra.mrb[60].mxu0 %vm3616_vm3, %v7804_v4  ;;  %5901 = vmatmul.mubr.msk.bf16.gmra.mrb[56].mxu1 %vm3616_vm3, %v7797_v41 }
 0x2f6   : > { %3941 = vmatprep.mubr.bf16.mxu0 %v6944_v30  ;;  %4439 = vmatprep.mubr.bf16.mxu1 %v6944_v30 }
 0x2f7   : > { %4459 = vmatpush1.bf16.msra.mxu1 %v3904_v42 }
 0x2f8   : > { %4539 = vmatprep.subr.bf16.mxu1 %v6792_v43 }
 0x2fd   : > { %5841 = vmatmul.mubr.msk.bf16.vlgmr.msra.gmra.mrb[48].mxu0 %vm3616_vm3, %v7758_v12  ;;  %5902 = vmatmul.mubr.msk.bf16.gmra.mrb[60].mxu1 %vm3616_vm3, %v7811_v36  ;;  %v6796_v12 = vld [vmem:[%s8197_s3 + $0xf8] ss:$8 sps:$4 sm:$0xff]  }
 0x2fe   : > { %3951 = vmatprep.mubr.bf16.mxu0 %v6944_v30  ;;  %4482 = vmatprep.mubr.bf16.mxu1 %v6944_v30 }
 0x2ff   : > { %4063 = vmatpush1.bf16.msra.mxu0 %v6790_v51 }
 0x300   : > { %4064 = vmatprep.subr.bf16.mxu0 %v6795_v52 }
 0x303   : > { %4065 = vmatpush1.bf16.msra.mxu0 %v6793_v53 }
 0x304   : > { %4066 = vmatprep.subr.bf16.mxu0 %v6798_v54 }
 0x305   : > { %5842 = vmatmul.mubr.msk.bf16.gmra.mrb[52].mxu0 %vm3616_vm3, %v7789_v13  ;;  %5904 = vmatmul.mubr.msk.bf16.vlgmr.msra.gmra.mrb[48].mxu1 %vm3616_vm3, %v7777_v50 }
 0x306   : > { %4540 = vmatpush1.bf16.msra.mxu1 %v6790_v51  ;;  %3961 = vmatprep.mubr.bf16.mxu0 %v6944_v30 }
 0x307   : > { %4492 = vmatprep.mubr.bf16.mxu1 %v6944_v30  ;;  %4541 = vmatprep.subr.bf16.mxu1 %v6795_v52 }
 0x308   : > { %4067 = vmatpush1.bf16.msra.mxu0 %v6796_v12 }
 0x309   : > { %4068 = vmatprep.subr.bf16.mxu0 %v6801_v55 }
 0x30a   : > { %4542 = vmatpush1.bf16.msra.mxu1 %v6793_v53 }
 0x30b   : > { %4543 = vmatprep.subr.bf16.mxu1 %v6798_v54 }
 0x30c   : > { %4069 = vmatpush1.bf16.msra.mxu0 %v6799_v57 }
 0x30d   : > { %5843 = vmatmul.mubr.msk.bf16.gmra.mrb[56].mxu0 %vm3616_vm3, %v7804_v4  ;;  %5905 = vmatmul.mubr.msk.bf16.gmra.mrb[52].mxu1 %vm3616_vm3, %v7797_v41 }
 0x30e   : > { %4544 = vmatpush1.bf16.msra.mxu1 %v6796_v12  ;;  %3971 = vmatprep.mubr.bf16.mxu0 %v6944_v30 }
 0x30f   : > { %4502 = vmatprep.mubr.bf16.mxu1 %v6944_v30  ;;  %5864 = vmatprep.subr.msk.bf16.mxu0 %vm3629_vm2, %v5863_v59 }
 0x310   : > { %4545 = vmatprep.subr.bf16.mxu1 %v6801_v55  ;;  %4071 = vmatpush1.bf16.msra.mxu0 %v4057_v60 }
 0x311   : > { %4215 = vmatprep.subr.bf16.mxu0 %v6806_v61 }
 0x312   : > { %4546 = vmatpush1.bf16.msra.mxu1 %v6799_v57 }
 0x313   : > { %5908 = vmatprep.subr.msk.bf16.mxu1 %vm3629_vm2, %v5863_v59 }
 0x315   : > { %5844 = vmatmul.mubr.msk.bf16.gmra.mrb[60].mxu0 %vm3616_vm3, %v7818_v3  ;;  %5906 = vmatmul.mubr.msk.bf16.gmra.mrb[56].mxu1 %vm3616_vm3, %v7811_v36 }
 0x316   : > { %4094 = vmatprep.mubr.bf16.mxu0 %v6944_v30  ;;  %4512 = vmatprep.mubr.bf16.mxu1 %v6944_v30 }
 0x317   : > { %4548 = vmatpush1.bf16.msra.mxu1 %v4057_v60 }
 0x318   : > { %4631 = vmatprep.subr.bf16.mxu1 %v6806_v61 }
 0x31d   : > { %5865 = vmatmul.mubr.msk.bf16.vlgmr.msra.gmra.mrb[48].mxu0 %vm3616_vm3, %v7777_v50  ;;  %5907 = vmatmul.mubr.msk.bf16.gmra.mrb[60].mxu1 %vm3616_vm3, %v7842_v25  ;;  %v6810_v50 = vld [vmem:[%s8197_s3 + $0x140] ss:$8 sps:$4 sm:$0xff]  }
 0x31e   : > { %4104 = vmatprep.mubr.bf16.mxu0 %v6944_v30  ;;  %4571 = vmatprep.mubr.bf16.mxu1 %v6944_v30 }
 0x31f   : > { %4216 = vmatpush1.bf16.msra.mxu0 %v6804_v62 }
 0x320   : > { %4217 = vmatprep.subr.bf16.mxu0 %v6809_v63 }
 0x323   : > { %4218 = vmatpush1.bf16.msra.mxu0 %v6807_v0 }
 0x324   : > { %4219 = vmatprep.subr.bf16.mxu0 %v6812_v1 }
 0x325   : > { %5866 = vmatmul.mubr.msk.bf16.gmra.mrb[52].mxu0 %vm3616_vm3, %v7797_v41  ;;  %5909 = vmatmul.mubr.msk.bf16.vlgmr.msra.gmra.mrb[48].mxu1 %vm3616_vm3, %v7789_v13 }
 0x326   : > { %4632 = vmatpush1.bf16.msra.mxu1 %v6804_v62  ;;  %4114 = vmatprep.mubr.bf16.mxu0 %v6944_v30 }
 0x327   : > { %4581 = vmatprep.mubr.bf16.mxu1 %v6944_v30  ;;  %4633 = vmatprep.subr.bf16.mxu1 %v6809_v63 }
 0x328   : > { %4220 = vmatpush1.bf16.msra.mxu0 %v6810_v50 }
 0x329   : > { %4221 = vmatprep.subr.bf16.mxu0 %v6815_v2 }
 0x32a   : > { %4634 = vmatpush1.bf16.msra.mxu1 %v6807_v0 }
 0x32b   : > { %4635 = vmatprep.subr.bf16.mxu1 %v6812_v1 }
 0x32c   : > { %4222 = vmatpush1.bf16.msra.mxu0 %v6813_v6 }
 0x32d   : > { %5867 = vmatmul.mubr.msk.bf16.gmra.mrb[56].mxu0 %vm3616_vm3, %v7811_v36  ;;  %5910 = vmatmul.mubr.msk.bf16.gmra.mrb[52].mxu1 %vm3616_vm3, %v7804_v4 }
 0x32e   : > { %4636 = vmatpush1.bf16.msra.mxu1 %v6810_v50  ;;  %4124 = vmatprep.mubr.bf16.mxu0 %v6944_v30 }
 0x32f   : > { %4591 = vmatprep.mubr.bf16.mxu1 %v6944_v30  ;;  %5888 = vmatprep.subr.msk.bf16.mxu0 %vm3629_vm2, %v5887_v8 }
 0x330   : > { %4637 = vmatprep.subr.bf16.mxu1 %v6815_v2  ;;  %4224 = vmatpush1.bf16.msra.mxu0 %v4210_v11 }
 0x332   : > { %4638 = vmatpush1.bf16.msra.mxu1 %v6813_v6 }
 0x333   : > { %5913 = vmatprep.subr.msk.bf16.mxu1 %vm3629_vm2, %v5887_v8 }
 0x335   : > { %5868 = vmatmul.mubr.msk.bf16.gmra.mrb[60].mxu0 %vm3616_vm3, %v7842_v25  ;;  %5911 = vmatmul.mubr.msk.bf16.gmra.mrb[56].mxu1 %vm3616_vm3, %v7818_v3 }
 0x336   : > { %4247 = vmatprep.mubr.bf16.mxu0 %v6944_v30  ;;  %4601 = vmatprep.mubr.bf16.mxu1 %v6944_v30 }
 0x337   : > { %4640 = vmatpush1.bf16.msra.mxu1 %v4210_v11 }
 0x33d   : > { %5889 = vmatmul.mubr.msk.bf16.vlgmr.msra.gmra.mrb[48].mxu0 %vm3616_vm3, %v7789_v13  ;;  %5912 = vmatmul.mubr.msk.bf16.gmra.mrb[60].mxu1 %vm3616_vm3, %v7862_v38  ;;  %v6819_v13 = vld [vmem:[%s8199_s5] sm:$0xff]  }
 0x33e   : > { %4257 = vmatprep.mubr.bf16.mxu0 %v6944_v30  ;;  %4663 = vmatprep.mubr.bf16.mxu1 %v6944_v30 }
 0x345   : > { %5890 = vmatmul.mubr.msk.bf16.gmra.mrb[52].mxu0 %vm3616_vm3, %v7804_v4  ;;  %5914 = vmatmul.mubr.msk.bf16.vlgmr.msra.gmra.mrb[48].mxu1 %vm3616_vm3, %v7797_v41  ;;  %v6945_v41 = vmov 0.0   ;;  %v6818_v4 = vld [vmem:[%s8199_s5 + $0x20] sm:$0xff]  }
 0x346   : > { %4267 = vmatprep.mubr.bf16.mxu0 %v6944_v30  ;;  %4673 = vmatprep.mubr.bf16.mxu1 %v6944_v30 }
 0x347   : > { %6021 = vmatprep.subr.bf16.mxu0 %v6945_v41  ;;  %6033 = vmatprep.subr.bf16.mxu1 %v6945_v41 }
 0x348   : > { %6034 = vmatpush3.bf16.msra.mxu1 %v6819_v13  ;;  %6022 = vmatpush3.bf16.msra.mxu0 %v6818_v4 }
 0x349   : > { %6035 = vmatprep.subr.bf16.mxu1 %v6945_v41  ;;  %6023 = vmatprep.subr.bf16.mxu0 %v6945_v41 }
 0x34d   : > { %5891 = vmatmul.mubr.msk.bf16.gmra.mrb[56].mxu0 %vm3616_vm3, %v7818_v3  ;;  %5915 = vmatmul.mubr.msk.bf16.gmra.mrb[52].mxu1 %vm3616_vm3, %v7811_v36  ;;  %v6823_v36 = vld [vmem:[%s8199_s5 + $0x10] sm:$0xff]   ;;  %v6820_v3 = vld [vmem:[%s8199_s5 + $0x28] sm:$0xff]  }
 0x34e   : > { %4277 = vmatprep.mubr.bf16.mxu0 %v6944_v30  ;;  %4683 = vmatprep.mubr.bf16.mxu1 %v6944_v30 }
 0x34f   : > { %6024 = vmatpush3.bf16.msra.mxu0 %v6820_v3 }
 0x350   : > { %6025 = vmatprep.subr.bf16.mxu0 %v6945_v41 }
 0x353   : > { %6026 = vmatpush3.bf16.msra.mxu0 %v6822_v15 }
 0x354   : > { %6027 = vmatprep.subr.bf16.mxu0 %v6945_v41 }
 0x355   : > { %5892 = vmatmul.mubr.msk.bf16.gmra.mrb[60].mxu0 %vm3616_vm3, %v7862_v38  ;;  %5916 = vmatmul.mubr.msk.bf16.gmra.mrb[56].mxu1 %vm3616_vm3, %v7842_v25 }
 0x356   : > { %4693 = vmatprep.mubr.bf16.mxu1 %v6944_v30  ;;  %v6821_v30 = vld [vmem:[%s8199_s5 + $0x8] sm:$0xff]   ;;  %6029 = vmatprep.mubr.msk.bf16.mxu0 %vm6946_vm4, %v6945_v41 }
 0x357   : > { %6036 = vmatpush3.bf16.msra.mxu1 %v6821_v30  ;;  %6028 = vmatpush3.bf16.msra.mxu0 %v6825_v16 }
 0x358   : > { %6037 = vmatprep.subr.bf16.mxu1 %v6945_v41  ;;  %6045 = vmatprep.subr.bf16.mxu0 %v6945_v41 }
 0x35b   : > { %6038 = vmatpush3.bf16.msra.mxu1 %v6823_v36 }
 0x35c   : > { %6039 = vmatprep.subr.bf16.mxu1 %v6945_v41 }
 0x35d   : > { %5917 = vmatmul.mubr.msk.bf16.gmra.mrb[60].mxu1 %vm3616_vm3, %v3551_v49 }
 0x35e   : > { %6041 = vmatprep.mubr.msk.bf16.mxu1 %vm6946_vm4, %v6945_v41 }
 0x35f   : > { %6040 = vmatpush3.bf16.msra.mxu1 %v6824_v14 }
 0x360   : > { %6057 = vmatprep.subr.bf16.mxu1 %v6945_v41 }
 0x410   : > { %v4249_v17 = vpop.f32.mrb[48].mxu0 }
 0x411   : > { %v4251_v19 = vpop.f32.mrb[49].mxu0 }
 0x412   : > { %v4253_v21 = vpop.f32.mrb[50].mxu0 }
 0x413   : > { %v4255_v9 = vpop.f32.mrb[51].mxu0 }
 0x418   : > { %v4259_v10 = vpop.f32.mrb[52].mxu0  ;;  %v4665_v18 = vpop.f32.mrb[48].mxu1 }
 0x419   : > { %v4720_v22 = vmax.f32 %v4249_v17, %v4665_v18  ;;  %v4261_v23 = vpop.f32.mrb[53].mxu0  ;;  %v4667_v24 = vpop.f32.mrb[49].mxu1 }
 0x41a   : > { %v4721_v25 = vmax.f32 %v4251_v19, %v4667_v24  ;;  %v4263_v26 = vpop.f32.mrb[54].mxu0  ;;  %v4669_v27 = vpop.f32.mrb[50].mxu1 }
 0x41b   : > { %v4722_v28 = vmax.f32 %v4253_v21, %v4669_v27  ;;  %v4265_v29 = vpop.f32.mrb[55].mxu0  ;;  %v4671_v31 = vpop.f32.mrb[51].mxu1 }
 0x41c   : > { %v4736_v32 = vmax.f32 %v4720_v22, %v4721_v25  ;;  %v4723_v46 = vmax.f32 %v4255_v9, %v4671_v31 }
 0x41e   : > { %v4751_v33 = vadd.f32 %v8061_v20, %v4736_v32  ;;  %v4737_v34 = vmax.f32 %v4722_v28, %v4723_v46 }
 0x420   : > { %v4759_v35 = vmul.f32 0.5, %v4751_v33  ;;  %v4752_v37 = vadd.f32 %v8061_v20, %v4737_v34  ;;  %v4269_v38 = vpop.f32.mrb[56].mxu0  ;;  %v4675_v39 = vpop.f32.mrb[52].mxu1  ;;  %v6829_v34 = vld [vmem:[%s8199_s5 + $0x68] sm:$0xff]  }
 0x421   : > { %v4724_v40 = vmax.f32 %v4259_v10, %v4675_v39  ;;  %v4271_v42 = vpop.f32.mrb[57].mxu0  ;;  %v4677_v43 = vpop.f32.mrb[53].mxu1 }
 0x422   : > { %6896 = vtanh.f32 %v4759_v35  ;;  %v4760_v44 = vmul.f32 0.5, %v4752_v37  ;;  %v4725_v45 = vmax.f32 %v4261_v23, %v4677_v43  ;;  %v4273_v47 = vpop.f32.mrb[58].mxu0  ;;  %v4679_v48 = vpop.f32.mrb[54].mxu1  ;;  %v6827_v23 = vld [vmem:[%s8199_s5 + $0x60] sm:$0xff]  }
 0x423   : > { %v4726_v49 = vmax.f32 %v4263_v26, %v4679_v48  ;;  %v4275_v51 = vpop.f32.mrb[59].mxu0  ;;  %v4681_v52 = vpop.f32.mrb[55].mxu1  ;;  %v6826_v43 = vld [vmem:[%s8199_s5 + $0x40] sm:$0xff]  }
 0x424   : > { %6898 = vtanh.f32 %v4760_v44  ;;  %v4738_v53 = vmax.f32 %v4724_v40, %v4725_v45  ;;  %v4727_v54 = vmax.f32 %v4265_v29, %v4681_v52  ;;  %v6831_v44 = vld [vmem:[%s8199_s5 + $0x70] sm:$0xff]  }
 0x426   : > { %v4753_v12 = vadd.f32 %v8061_v20, %v4738_v53  ;;  %v4739_v55 = vmax.f32 %v4726_v49, %v4727_v54  ;;  %v6828_v49 = vld [vmem:[%s8199_s5 + $0x48] sm:$0xff]  }
 0x428   : > { %v4761_v56 = vmul.f32 0.5, %v4753_v12  ;;  %v4754_v57 = vadd.f32 %v8061_v20, %v4739_v55  ;;  %v4279_v58 = vpop.f32.mrb[60].mxu0  ;;  %v4685_v59 = vpop.f32.mrb[56].mxu1  ;;  %v6830_v12 = vld [vmem:[%s8199_s5 + $0x50] sm:$0xff]  }
 0x429   : > { %v4728_v60 = vmax.f32 %v4269_v38, %v4685_v59  ;;  %v4281_v61 = vpop.f32.mrb[61].mxu0  ;;  %v4687_v62 = vpop.f32.mrb[57].mxu1  ;;  %v6832_v59 = vld [vmem:[%s8199_s5 + $0x58] sm:$0xff]  }
 0x42a   : > { %6900 = vtanh.f32 %v4761_v56  ;;  %v4762_v63 = vmul.f32 0.5, %v4754_v57  ;;  %v4729_v0 = vmax.f32 %v4271_v42, %v4687_v62  ;;  %v4283_v1 = vpop.f32.mrb[62].mxu0  ;;  %v4689_v50 = vpop.f32.mrb[58].mxu1 }
 0x42b   : > { %v4730_v2 = vmax.f32 %v4273_v47, %v4689_v50  ;;  %v4285_v5 = vpop.f32.mrb[63].mxu0  ;;  %v4691_v6 = vpop.f32.mrb[59].mxu1  ;;  %v6836_v50 = vld [vmem:[%s8201_s7 + $0x10] sm:$0xff]  }
 0x42c   : > { %v6897_v7 = vpop.eup %6896  ;;  %6902 = vtanh.f32 %v4762_v63  ;;  %v4740_v8 = vmax.f32 %v4728_v60, %v4729_v0  ;;  %v4731_v11 = vmax.f32 %v4275_v51, %v4691_v6  ;;  %v6833_v51 = vld [vmem:[%s8199_s5 + $0x78] sm:$0xff]   ;;  %v6834_v0 = vld [vmem:[%s8201_s7] sm:$0xff]   ;;  %v6839_v6 = vld [vmem:[%s8201_s7 + $0x28] sm:$0xff]  }
 0x42d   : > { %v4775_v13 = vmul.f32 0.5, %v6897_v7  ;;  %v6840_v7 = vld [vmem:[%s8201_s7 + $0x30] sm:$0xff]  }
 0x42e   : > { %v6899_v30 = vpop.eup %6898  ;;  %v4755_v4 = vadd.f32 %v8061_v20, %v4740_v8  ;;  %v4741_v36 = vmax.f32 %v4730_v2, %v4731_v11  ;;  %v6837_v2 = vld [vmem:[%s8201_s7 + $0x18] sm:$0xff]  }
 0x42f   : > { %v4776_v3 = vmul.f32 0.5, %v6899_v30  ;;  %v4783_v17 = vadd.f32 0.5, %v4775_v13  ;;  %v6841_v8 = vld [vmem:[%s8201_s7 + $0x38] ss:$0 sps:$4 sm:$0xff]  }
 0x430   : > { %v4763_v14 = vmul.f32 0.5, %v4755_v4  ;;  %v4756_v15 = vadd.f32 %v8061_v20, %v4741_v36  ;;  %v4695_v16 = vpop.f32.mrb[60].mxu1  ;;  %v5197_v11 = vsel %vm3629_vm2, %v6841_v8, 0 }
 0x431   : > { %v4784_v19 = vadd.f32 0.5, %v4776_v3  ;;  %v4732_v21 = vmax.f32 %v4279_v58, %v4695_v16  ;;  %v4697_v9 = vpop.f32.mrb[61].mxu1 }
 0x432   : > { %6904 = vtanh.f32 %v4763_v14  ;;  %v4764_v10 = vmul.f32 0.5, %v4756_v15  ;;  %v4733_v18 = vmax.f32 %v4281_v61, %v4697_v9  ;;  %v4699_v22 = vpop.f32.mrb[62].mxu1 }
 0x433   : > { %v4791_v24 = vpack.c.bf16 %v4784_v19, %v4783_v17  ;;  %v4734_v25 = vmax.f32 %v4283_v1, %v4699_v22  ;;  %v4701_v26 = vpop.f32.mrb[63].mxu1  ;;  %v6835_v1 = vld [vmem:[%s8201_s7 + $0x8] sm:$0xff]  }
 0x434   : > { %v6901_v27 = vpop.eup %6900  ;;  %6906 = vtanh.f32 %v4764_v10  ;;  %v4742_v28 = vmax.f32 %v4732_v21, %v4733_v18  ;;  %v4735_v29 = vmax.f32 %v4285_v5, %v4701_v26  ;;  %v6838_v5 = vld [vmem:[%s8201_s7 + $0x20] sm:$0xff]  }
 0x435   : > { %v4777_v31 = vmul.f32 0.5, %v6901_v27  ;;  %6042 = vmatmul.mubr.msk.bf16.vlgmr.msra.gmra.mrb[64].mxu1 %vm4836_vm5, %v4791_v24 }
 0x436   : > { %v6903_v32 = vpop.eup %6902  ;;  %v4757_v46 = vadd.f32 %v8061_v20, %v4742_v28  ;;  %v4743_v33 = vmax.f32 %v4734_v25, %v4735_v29  ;;  %6058 = vmatpush3.bf16.msra.mxu1 %v6827_v23  ;;  %6065 = vmatprep.mubr.msk.bf16.mxu1 %vm6946_vm4, %v6945_v41  ;;  %v5963_v23 = vld [vmem:[%s8200_s6] ss:$0 sm:$0xff] }
 0x437   : > { %v4778_v35 = vmul.f32 0.5, %v6903_v32  ;;  %6059 = vmatprep.subr.bf16.mxu1 %v6945_v41  ;;  %v4785_v39 = vadd.f32 0.5, %v4777_v31 }
 0x438   : > { %v4765_v37 = vmul.f32 0.5, %v4757_v46  ;;  %v4758_v38 = vadd.f32 %v8061_v20, %v4743_v33 }
 0x439   : > { %v4786_v40 = vadd.f32 0.5, %v4778_v35 }
 0x43a   : > { %6908 = vtanh.f32 %v4765_v37  ;;  %v4766_v42 = vmul.f32 0.5, %v4758_v38  ;;  %6060 = vmatpush3.bf16.msra.mxu1 %v6829_v34 }
 0x43b   : > { %v4792_v45 = vpack.c.bf16 %v4786_v40, %v4785_v39  ;;  %6061 = vmatprep.subr.bf16.mxu1 %v6945_v41 }
 0x43c   : > { %v6905_v47 = vpop.eup %6904  ;;  %6910 = vtanh.f32 %v4766_v42 }
 0x43d   : > { %v4779_v48 = vmul.f32 0.5, %v6905_v47  ;;  %6030 = vmatmul.mubr.msk.bf16.vlgmr.msra.gmra.mrb[64].mxu0 %vm4836_vm5, %v4792_v45  ;;  %v6843_v45 = vld [vmem:[%s8203_s9 + $0x8] sm:$0xff]   ;;  %v6844_v47 = vld [vmem:[%s8203_s9 + $0x10] sm:$0xff]  }
 0x43e   : > { %v6907_v20 = vpop.eup %6906  ;;  %6046 = vmatpush3.bf16.msra.mxu0 %v6826_v43  ;;  %6062 = vmatpush3.bf16.msra.mxu1 %v6831_v44  ;;  %v6842_v44 = vld [vmem:[%s8203_s9] sm:$0xff]  }
 0x43f   : > { %v4780_v52 = vmul.f32 0.5, %v6907_v20  ;;  %6047 = vmatprep.subr.bf16.mxu0 %v6945_v41  ;;  %6063 = vmatprep.subr.bf16.mxu1 %v6945_v41  ;;  %v4787_v53 = vadd.f32 0.5, %v4779_v48  ;;  %v6845_v48 = vld [vmem:[%s8203_s9 + $0x18] sm:$0xff]   ;;  %v6846_v20 = vld [vmem:[%s8203_s9 + $0x20] sm:$0xff]  }
 0x440   : > { %6053 = vmatprep.mubr.msk.bf16.mxu0 %vm6946_vm4, %v6945_v41 }
 0x441   : > { %v4788_v54 = vadd.f32 0.5, %v4780_v52  ;;  %v5964_v52 = vld [vmem:[%s8202_s8] ss:$0 sm:$0xff] }
 0x442   : > { %6048 = vmatpush3.bf16.msra.mxu0 %v6828_v49  ;;  %6064 = vmatpush3.bf16.msra.mxu1 %v6833_v51  ;;  %v6847_v49 = vld [vmem:[%s8203_s9 + $0x28] ss:$0 sps:$4 sm:$0x33]  }
 0x443   : > { %v4793_v55 = vpack.c.bf16 %v4788_v54, %v4787_v53  ;;  %6049 = vmatprep.subr.bf16.mxu0 %v6945_v41  ;;  %6089 = vmatprep.subr.bf16.mxu1 %v6945_v41  ;;  %v5306_v51 = vsel %vm5304_vm7, %v6847_v49, 0 }
 0x444   : > { %v6909_v56 = vpop.eup %6908 }
 0x445   : > { %v4781_v57 = vmul.f32 0.5, %v6909_v56 }
 0x446   : > { %v6911_v58 = vpop.eup %6910  ;;  %6050 = vmatpush3.bf16.msra.mxu0 %v6830_v12 }
 0x447   : > { %v4782_v60 = vmul.f32 0.5, %v6911_v58  ;;  %6051 = vmatprep.subr.bf16.mxu0 %v6945_v41  ;;  %v4789_v61 = vadd.f32 0.5, %v4781_v57 }
 0x449   : > { %v4790_v62 = vadd.f32 0.5, %v4782_v60 }
 0x44a   : > { %6052 = vmatpush3.bf16.msra.mxu0 %v6832_v59 }
 0x44b   : > { %v4794_v63 = vpack.c.bf16 %v4790_v62, %v4789_v61  ;;  %6069 = vmatprep.subr.bf16.mxu0 %v6945_v41 }
 0x44d   : > { %6054 = vmatmul.mubr.msk.bf16.vlgmr.msra.gmra.mrb[68].mxu0 %vm4836_vm5, %v4793_v55  ;;  %6066 = vmatmul.mubr.msk.bf16.vlgmr.msra.gmra.mrb[68].mxu1 %vm4836_vm5, %v4794_v63 }
 0x44e   : > { %6085 = vmatprep.mubr.msk.bf16.mxu0 %vm6946_vm4, %v6945_v41  ;;  %6101 = vmatprep.mubr.msk.bf16.mxu1 %vm6946_vm4, %v6945_v41 }
 0x44f   : > { %6070 = vmatpush3.bf16.msra.mxu0 %v6834_v0  ;;  %6090 = vmatpush3.bf16.msra.mxu1 %v6842_v44 }
 0x450   : > { %6071 = vmatprep.subr.bf16.mxu0 %v6945_v41  ;;  %6091 = vmatprep.subr.bf16.mxu1 %v6945_v41 }
 0x453   : > { %6072 = vmatpush3.bf16.msra.mxu0 %v6835_v1  ;;  %6092 = vmatpush3.bf16.msra.mxu1 %v6843_v45 }
 0x454   : > { %6073 = vmatprep.subr.bf16.mxu0 %v6945_v41  ;;  %6093 = vmatprep.subr.bf16.mxu1 %v6945_v41 }
 0x457   : > { %6074 = vmatpush3.bf16.msra.mxu0 %v6836_v50  ;;  %6094 = vmatpush3.bf16.msra.mxu1 %v6844_v47  ;;  %v5974_v50 = vld [vmem:[%s8204_s10] ss:$0 sm:$0xff] }
 0x458   : > { %6075 = vmatprep.subr.bf16.mxu0 %v6945_v41  ;;  %6095 = vmatprep.subr.bf16.mxu1 %v6945_v41 }
 0x45b   : > { %6076 = vmatpush3.bf16.msra.mxu0 %v6837_v2  ;;  %6096 = vmatpush3.bf16.msra.mxu1 %v6845_v48 }
 0x45c   : > { %6077 = vmatprep.subr.bf16.mxu0 %v6945_v41  ;;  %6097 = vmatprep.subr.bf16.mxu1 %v6945_v41 }
 0x45f   : > { %6078 = vmatpush3.bf16.msra.mxu0 %v6838_v5  ;;  %6098 = vmatpush3.bf16.msra.mxu1 %v6846_v20 }
 0x460   : > { %6079 = vmatprep.subr.bf16.mxu0 %v6945_v41  ;;  %6099 = vmatprep.subr.bf16.mxu1 %v6945_v41 }
 0x463   : > { %6080 = vmatpush3.bf16.msra.mxu0 %v6839_v6  ;;  %6100 = vmatpush3.bf16.msra.mxu1 %v5306_v51 }
 0x464   : > { %6081 = vmatprep.subr.bf16.mxu0 %v6945_v41 }
 0x467   : > { %6082 = vmatpush3.bf16.msra.mxu0 %v6840_v7 }
 0x468   : > { %6083 = vmatprep.subr.bf16.mxu0 %v6945_v41 }
 0x46b   : > { %6084 = vmatpush3.bf16.msra.mxu0 %v5197_v11 }
 0x508   : > { %v4942_v13 = vpop.f32.mrb[64].mxu1 }
 0x509   : > { %v6043_v30 = vpop.f32.mrb[65].mxu1 }
 0x50a   : > { %v4945_v4 = vpop.f32.mrb[66].mxu1 }
 0x50b   : > { %v6044_v36 = vpop.f32.mrb[67].mxu1 }
 0x510   : > { %v4874_v3 = vpop.f32.mrb[64].mxu0 }
 0x511   : > { %v4943_v14 = vadd.f32 %v4942_v13, %v4874_v3  ;;  %v6031_v15 = vpop.f32.mrb[65].mxu0 }
 0x512   : > { %v4877_v16 = vpop.f32.mrb[66].mxu0 }
 0x513   : > { %v4946_v17 = vadd.f32 %v4945_v4, %v4877_v16  ;;  %v6032_v19 = vpop.f32.mrb[67].mxu0 }
 0x520   : > { %v5019_v21 = vpop.f32.mrb[68].mxu0  ;;  %v5098_v9 = vpop.f32.mrb[68].mxu1 }
 0x521   : > { %v5026_v10 = vadd.f32 %v5019_v21, %v4943_v14  ;;  %v6055_v18 = vpop.f32.mrb[69].mxu0  ;;  %v6067_v22 = vpop.f32.mrb[69].mxu1 }
 0x522   : > { %v5022_v24 = vpop.f32.mrb[70].mxu0  ;;  %v5101_v25 = vpop.f32.mrb[70].mxu1 }
 0x523   : > { %v5105_v26 = vadd.f32 %v5098_v9, %v5026_v10  ;;  %v5027_v27 = vadd.f32 %v5022_v24, %v4946_v17  ;;  %v6056_v28 = vpop.f32.mrb[71].mxu0  ;;  %v6068_v29 = vpop.f32.mrb[71].mxu1 }
 0x525   : > { %v5114_v31 = vadd.f32 %v5963_v23, %v5105_v26  ;;  %v5106_v32 = vadd.f32 %v5101_v25, %v5027_v27 }
 0x527   : > { %v5116_v46 = vmul.f32 0.5, %v5114_v31  ;;  %v5115_v33 = vadd.f32 %v5963_v23, %v5106_v32 }
 0x529   : > { %6912 = vtanh.f32 %v5116_v46  ;;  %v5117_v34 = vmul.f32 0.5, %v5115_v33 }
 0x52b   : > { %6914 = vtanh.f32 %v5117_v34 }
 0x533   : > { %v6913_v35 = vpop.eup %6912 }
 0x534   : > { %v5120_v37 = vmul.f32 0.5, %v6913_v35 }
 0x535   : > { %v6915_v38 = vpop.eup %6914 }
 0x536   : > { %v5121_v39 = vmul.f32 0.5, %v6915_v38  ;;  %v5122_v40 = vadd.f32 0.5, %v5120_v37 }
 0x538   : > { %v5123_v42 = vadd.f32 0.5, %v5121_v39 }
 0x53a   : > { %v5124_v43 = vpack.c.bf16 %v5123_v42, %v5122_v40 }
 0x53c   : > { %6086 = vmatmul.mubr.msk.bf16.vlgmr.msra.gmra.mrb[72].mxu0 %vm5192_vm6, %v5124_v43 }
 0x60f   : > { %v5233_v53 = vpop.f32.mrb[72].mxu0 }
 0x610   : > { %v5234_v54 = vadd.f32 %v5964_v52, %v5233_v53  ;;  %v6087_v12 = vpop.f32.mrb[73].mxu0 }
 0x611   : > { %v5236_v55 = vpop.f32.mrb[74].mxu0 }
 0x612   : > { %v5240_v56 = vmul.f32 0.5, %v5234_v54  ;;  %v5237_v57 = vadd.f32 %v5964_v52, %v5236_v55  ;;  %v6088_v58 = vpop.f32.mrb[75].mxu0 }
 0x614   : > { %6916 = vtanh.f32 %v5240_v56  ;;  %v5241_v41 = vmul.f32 0.5, %v5237_v57 }
 0x616   : > { %6918 = vtanh.f32 %v5241_v41 }
 0x61e   : > { %v6917_v59 = vpop.eup %6916 }
 0x61f   : > { %v5244_v60 = vmul.f32 0.5, %v6917_v59 }
 0x620   : > { %v6919_v61 = vpop.eup %6918 }
 0x621   : > { %v5245_v62 = vmul.f32 0.5, %v6919_v61  ;;  %v5246_v63 = vadd.f32 0.5, %v5244_v60 }
 0x623   : > { %v5247_v0 = vadd.f32 0.5, %v5245_v62 }
 0x625   : > { %v5248_v1 = vpack.c.bf16 %v5247_v0, %v5246_v63 }
 0x627   : > { %6102 = vmatmul.mubr.msk.bf16.vlgmr.msra.gmra.mrb[72].mxu1 %vm5300_vm8, %v5248_v1 }
 0x6fa   : > { %v5342_v2 = vpop.f32.mrb[72].mxu1 }
 0x6fb   : > { %v5343_v5 = vadd.f32 %v5974_v50, %v5342_v2  ;;  %v6103_v6 = vpop.f32.mrb[73].mxu1 }
 0x6fc   : > { %v5345_v7 = vpop.f32.mrb[74].mxu1 }
 0x6fd   : > { %5350 = vst.msk [vmem:[%s649_s12] sm:$0xff] %vm5349_vm9, %v5343_v5  ;;  %v5346_v8 = vadd.f32 %v5974_v50, %v5345_v7  ;;  %v6104_v11 = vpop.f32.mrb[75].mxu1 }
 0x6ff   : > { %5351 = vst.msk [vmem:[%s649_s12 + $0x8] sm:$0xff] %vm5349_vm9, %v5346_v8 }
 0x700 PF: > { %p18_p9 = scmp.ge.s32.totalorder %s7024_s21, 4   ;;  %s8206_s17 = smov %s6938_s18 }
 0x701   : > { %s8207_s18 = smov %s7033_s24  ;;  %s8208_s19 = smov %s7024_s21 }
 0x702   :  { %20 = sbr.rel (!%p18_p9) target bundleno = 2 (0x2), region = 156 }

</bundles_post_ra>
